<compile_context>
chip_gen: v6e
topology: v6e:2x2x1
jax: 0.10.0
libtpu: 0.0.40
codegen_flags: <defaults>
</compile_context>

<pallas_src>
import jax
import jax.numpy as jnp
from jax.experimental import pallas as pl
from jax.experimental.pallas import tpu as pltpu

ZE_DIM = 64            # args.ze (encoder input latent size)
Z_DIM = 64             # args.z  (per-head output latent size)
H_DIM = 512
OUT_DIM = 6 * Z_DIM    # 384 = 3 * 128 (lane-dense)
BN_EPS = 1e-5

# ---- VMEM sizing for the grid-less single-shot kernel -----------------------
# Conservative per-row activation footprint: bf16 x (128 B) + f32 h1/h2/y
# (~5.5 KB) + bf16 inter-layer casts (~2 KB) + f32 out (1.5 KB)  ->  8 KB/row.
_ROW_VMEM_BYTES = 8 * 1024
# Resident weights: bf16 W1/W2/W3 copies + f32 pk/b3  (~1 MiB total).
_WEIGHT_VMEM_BYTES = (2 * (ZE_DIM * H_DIM + H_DIM * H_DIM + H_DIM * OUT_DIM)
                      + 4 * (6 * H_DIM + OUT_DIM))
_VMEM_BUDGET_BYTES = 48 << 20   # leaves headroom inside v7x's 64 MiB physical VMEM
MAX_SINGLE_SHOT_ROWS = (
    (_VMEM_BUDGET_BYTES - _WEIGHT_VMEM_BYTES - (2 << 20)) // _ROW_VMEM_BYTES
)


def _bn_elu(h, gamma, beta):
    """Train-mode BatchNorm1d (batch mean, biased batch variance, two-pass)
    followed by ELU(alpha=1).  NOTE: PyTorch raises for B == 1 in train mode;
    here B == 1 silently yields rsqrt(eps)-scaled outputs."""
    mean = jnp.mean(h, axis=0, keepdims=True)
    centered = h - mean
    var = jnp.mean(centered * centered, axis=0, keepdims=True)
    h = centered * (gamma * jax.lax.rsqrt(var + BN_EPS)) + beta
    return jnp.where(h > 0, h, jnp.exp(jnp.minimum(h, 0.0)) - 1.0)


def encoder_kernel(x_ref, w1_ref, pk_ref, b3_ref, w2_hbm, w3_hbm, o_ref,
                   w2_buf, w3_buf, sem):
    # W2 is needed first (layer 2): issue its HBM->VMEM DMA immediately so it
    # hides behind the layer-1 matmul + BN reduction.
    cp2 = pltpu.make_async_copy(w2_hbm, w2_buf, sem.at[0])
    cp3 = pltpu.make_async_copy(w3_hbm, w3_buf, sem.at[1])
    cp2.start()

    # --- layer 1: Linear(ze, 512) ---  (x is already bf16; f32 accumulate)
    h = jnp.dot(x_ref[...], w1_ref[...], preferred_element_type=jnp.float32)

    # W3 is only needed at layer 3: issue it after layer 1 so it does not steal
    # HBM bandwidth from the W2 copy we are about to wait on.
    cp3.start()

    h = _bn_elu(h + pk_ref[0:1, :],                   # + b1
                pk_ref[1:2, :], pk_ref[2:3, :])       # g1, beta1

    # --- layer 2: Linear(512, 512) -> BN2 -> ELU ---
    cp2.wait()
    h = jnp.dot(h.astype(jnp.bfloat16), w2_buf[...],
                preferred_element_type=jnp.float32)
    h = _bn_elu(h + pk_ref[3:4, :],                   # + b2
                pk_ref[4:5, :], pk_ref[5:6, :])       # g2, beta2

    # --- layer 3: Linear(512, 6*z) ---
    cp3.wait()
    y = jnp.dot(h.astype(jnp.bfloat16), w3_buf[...],
                preferred_element_type=jnp.float32)
    o_ref[...] = (y + b3_ref[...]).astype(o_ref.dtype)


@jax.jit
def encoder_forward(x, params):
    """x: any shape with trailing size a multiple of ZE_DIM.

    Returns a single [B, 6, Z_DIM] float32 array.  Consumers should index
    heads as y[:, i]; materializing six strided slices doubles output HBM
    traffic and adds per-op dispatch overhead (see encoder_forward_heads for
    an API-parity helper).
    """
    # bf16 input halves the x DMA; the matmul accumulates in f32 regardless.
    x2d = x.reshape(-1, ZE_DIM).astype(jnp.bfloat16)
    B = x2d.shape[0]
    assert B <= MAX_SINGLE_SHOT_ROWS, (
        f"B={B} exceeds the single-shot VMEM budget ({MAX_SINGLE_SHOT_ROWS} rows); "
        "a batch-tiled variant is required for larger batches.")
    # TODO(synk): batch-tiled path (grid over B + two-pass BN accumulation) for
    # B > MAX_SINGLE_SHOT_ROWS and to use both TensorCores on v7x.

    vmem_needed = _WEIGHT_VMEM_BYTES + B * _ROW_VMEM_BYTES + (2 << 20)
    vmem_limit = int(min(max(vmem_needed, 32 << 20), _VMEM_BUDGET_BYTES))

    vmem = pl.BlockSpec(memory_space=pltpu.MemorySpace.VMEM)
    hbm = pl.BlockSpec(memory_space=pl.ANY)

    y = pl.pallas_call(
        encoder_kernel,
        out_shape=jax.ShapeDtypeStruct((B, OUT_DIM), jnp.float32),
        in_specs=[vmem, vmem, vmem, vmem, hbm, hbm],
        out_specs=vmem,
        scratch_shapes=[
            pltpu.VMEM((H_DIM, H_DIM), jnp.bfloat16),    # W2 landing buffer
            pltpu.VMEM((H_DIM, OUT_DIM), jnp.bfloat16),  # W3 landing buffer
            pltpu.SemaphoreType.DMA((2,)),
        ],
        compiler_params=pltpu.CompilerParams(vmem_limit_bytes=vmem_limit),
    )(x2d, params["w1"], params["pk"], params["b3"], params["w2"], params["w3"])

    # [B, 384] -> [B, 6, z] is a metadata-only reshape (no data movement).
    return y.reshape(-1, 6, Z_DIM)


def encoder_forward_heads(x, params):
    """API-parity helper matching the PyTorch module's 6-tuple return.
    Prefer consuming encoder_forward's [B, 6, z] array directly."""
    y = encoder_forward(x, params)
    return tuple(y[:, i] for i in range(6))


def init_params(key):
    """Deterministic synthetic parameters matching Encoder's shapes."""
    ks = jax.random.split(key, 6)

    def linear_init(kw, kb, fan_in, fan_out):
        # PyTorch nn.Linear default: U(-1/sqrt(fan_in), 1/sqrt(fan_in)).
        bound = 1.0 / float(fan_in) ** 0.5
        w = jax.random.uniform(kw, (fan_in, fan_out), jnp.float32, -bound, bound)
        b = jax.random.uniform(kb, (1, fan_out), jnp.float32, -bound, bound)
        return w.astype(jnp.bfloat16), b

    w1, b1 = linear_init(ks[0], ks[1], ZE_DIM, H_DIM)
    w2, b2 = linear_init(ks[2], ks[3], H_DIM, H_DIM)
    w3, b3 = linear_init(ks[4], ks[5], H_DIM, OUT_DIM)

    ones = jnp.ones((1, H_DIM), jnp.float32)    # BN gammas (fresh-module default)
    zeros = jnp.zeros((1, H_DIM), jnp.float32)  # BN betas
    # Packed per-feature params: rows = [b1, g1, beta1, b2, g2, beta2].
    pk = jnp.concatenate([b1, ones, zeros, b2, ones, zeros], axis=0)  # [6, 512]

    return {"w1": w1, "w2": w2, "w3": w3, "pk": pk, "b3": b3}


def _reference_forward(x, p):
    # Pure-JAX reference mirroring the kernel's intended math (bf16 weights /
    # activations, f32 accumulation, two-pass BN).  Validates kernel
    # correctness; the bf16 flavor is an intentional deviation from PyTorch's
    # full-f32 forward.
    pk = p["pk"]
    xb = x.reshape(-1, ZE_DIM).astype(jnp.bfloat16)
    h = jnp.dot(xb, p["w1"], preferred_element_type=jnp.float32) + pk[0:1]
    h = _bn_elu(h, pk[1:2], pk[2:3])
    h = jnp.dot(h.astype(jnp.bfloat16), p["w2"],
                preferred_element_type=jnp.float32) + pk[3:4]
    h = _bn_elu(h, pk[4:5], pk[5:6])
    y = jnp.dot(h.astype(jnp.bfloat16), p["w3"],
                preferred_element_type=jnp.float32) + p["b3"]
    return y.reshape(-1, 6, Z_DIM)


if __name__ == "__main__":
    key = jax.random.PRNGKey(0)
    k_param, k_x = jax.random.split(key)
    params = init_params(k_param)

    B = 8
    x = jax.random.normal(k_x, (B, ZE_DIM), jnp.float32)

    y = encoder_forward(x, params)
    y = jax.block_until_ready(y)
    assert y.shape == (B, 6, Z_DIM), y.shape

    # API-parity 6-tuple (kept out of the jitted hot path).
    heads = encoder_forward_heads(x, params)
    assert len(heads) == 6
    for h in heads:
        assert h.shape == (B, Z_DIM), h.shape

    ref = _reference_forward(x, params)
    err = float(jnp.max(jnp.abs(y - ref)))
    assert jnp.allclose(y, ref, atol=2e-2, rtol=2e-2), err

    print("KERNEL_OK")
</pallas_src>

<mosaic_0001>
module attributes {stable_mosaic.version = 11 : i64} {
  func.func @encoder_kernel(%arg0: memref<8x64xbf16, #tpu.memory_space<vmem>>, %arg1: memref<64x512xbf16, #tpu.memory_space<vmem>>, %arg2: memref<6x512xf32, #tpu.memory_space<vmem>>, %arg3: memref<1x384xf32, #tpu.memory_space<vmem>>, %arg4: memref<512x512xbf16, #tpu.memory_space<any>>, %arg5: memref<512x384xbf16, #tpu.memory_space<any>>, %arg6: memref<8x384xf32, #tpu.memory_space<vmem>>, %arg7: memref<512x512xbf16, #tpu.memory_space<vmem>>, %arg8: memref<512x384xbf16, #tpu.memory_space<vmem>>, %arg9: memref<2x!tpu.dma_semaphore, #tpu.memory_space<semaphore_mem>>) attributes {dimension_semantics = [], scalar_prefetch = 0 : i64, scratch_operands = 3 : i64, tpu.core_type = #tpu.core_type<tc>} {
    %c0_i32 = arith.constant 0 : i32
    %0 = tpu.memref_slice %arg9[%c0_i32] : memref<2x!tpu.dma_semaphore, #tpu.memory_space<semaphore_mem>> -> memref<1x!tpu.dma_semaphore, #tpu.memory_space<semaphore_mem>>
    %1 = tpu.memref_squeeze %0 : memref<1x!tpu.dma_semaphore, #tpu.memory_space<semaphore_mem>> -> memref<!tpu.dma_semaphore, #tpu.memory_space<semaphore_mem>>
    tpu.enqueue_dma source(%arg4 : memref<512x512xbf16, #tpu.memory_space<any>>) target(%arg7 : memref<512x512xbf16, #tpu.memory_space<vmem>>) target_semaphore(%1 : memref<!tpu.dma_semaphore, #tpu.memory_space<semaphore_mem>>)
    %c0 = arith.constant 0 : index
    %c0_0 = arith.constant 0 : index
    %2 = vector.load %arg0[%c0, %c0_0] : memref<8x64xbf16, #tpu.memory_space<vmem>>, vector<8x64xbf16>
    %c0_1 = arith.constant 0 : index
    %c0_2 = arith.constant 0 : index
    %3 = vector.load %arg1[%c0_1, %c0_2] : memref<64x512xbf16, #tpu.memory_space<vmem>>, vector<64x512xbf16>
    %cst = arith.constant dense<0.000000e+00> : vector<8x512xf32>
    %4 = tpu.matmul %2, %3, %cst {dimension_numbers = #tpu.dot_dimension_numbers<[1], [0], [0], [1], [0, 0, 1, 1], [], []>} : vector<8x64xbf16>, vector<64x512xbf16>, vector<8x512xf32> -> vector<8x512xf32>
    %c1_i32 = arith.constant 1 : i32
    %5 = tpu.memref_slice %arg9[%c1_i32] : memref<2x!tpu.dma_semaphore, #tpu.memory_space<semaphore_mem>> -> memref<1x!tpu.dma_semaphore, #tpu.memory_space<semaphore_mem>>
    %6 = tpu.memref_squeeze %5 : memref<1x!tpu.dma_semaphore, #tpu.memory_space<semaphore_mem>> -> memref<!tpu.dma_semaphore, #tpu.memory_space<semaphore_mem>>
    tpu.enqueue_dma source(%arg5 : memref<512x384xbf16, #tpu.memory_space<any>>) target(%arg8 : memref<512x384xbf16, #tpu.memory_space<vmem>>) target_semaphore(%6 : memref<!tpu.dma_semaphore, #tpu.memory_space<semaphore_mem>>)
    %c0_3 = arith.constant 0 : index
    %c0_4 = arith.constant 0 : index
    %7 = vector.load %arg2[%c0_3, %c0_4] : memref<6x512xf32, #tpu.memory_space<vmem>>, vector<1x512xf32>
    %8 = vector.broadcast %7 : vector<1x512xf32> to vector<8x512xf32>
    %9 = arith.addf %4, %8 : vector<8x512xf32>
    %c1 = arith.constant 1 : index
    %c0_5 = arith.constant 0 : index
    %10 = vector.load %arg2[%c1, %c0_5] : memref<6x512xf32, #tpu.memory_space<vmem>>, vector<1x512xf32>
    %c2 = arith.constant 2 : index
    %c0_6 = arith.constant 0 : index
    %11 = vector.load %arg2[%c2, %c0_6] : memref<6x512xf32, #tpu.memory_space<vmem>>, vector<1x512xf32>
    %cst_7 = arith.constant dense<0.000000e+00> : vector<512xf32>
    %12 = vector.multi_reduction <add>, %9, %cst_7 [0] : vector<8x512xf32> to vector<512xf32>
    %13 = vector.shape_cast %12 : vector<512xf32> to vector<1x512xf32>
    %cst_8 = arith.constant 8.000000e+00 : f32
    %14 = vector.broadcast %cst_8 : f32 to vector<1x512xf32>
    %15 = arith.divf %13, %14 : vector<1x512xf32>
    %16 = vector.broadcast %15 : vector<1x512xf32> to vector<8x512xf32>
    %17 = arith.subf %9, %16 : vector<8x512xf32>
    %18 = arith.mulf %17, %17 : vector<8x512xf32>
    %cst_9 = arith.constant dense<0.000000e+00> : vector<512xf32>
    %19 = vector.multi_reduction <add>, %18, %cst_9 [0] : vector<8x512xf32> to vector<512xf32>
    %20 = vector.shape_cast %19 : vector<512xf32> to vector<1x512xf32>
    %cst_10 = arith.constant 8.000000e+00 : f32
    %21 = vector.broadcast %cst_10 : f32 to vector<1x512xf32>
    %22 = arith.divf %20, %21 : vector<1x512xf32>
    %cst_11 = arith.constant 9.99999974E-6 : f32
    %23 = vector.broadcast %cst_11 : f32 to vector<1x512xf32>
    %24 = arith.addf %22, %23 : vector<1x512xf32>
    %25 = math.rsqrt %24 : vector<1x512xf32>
    %26 = arith.mulf %10, %25 : vector<1x512xf32>
    %27 = vector.broadcast %26 : vector<1x512xf32> to vector<8x512xf32>
    %28 = arith.mulf %17, %27 : vector<8x512xf32>
    %29 = vector.broadcast %11 : vector<1x512xf32> to vector<8x512xf32>
    %30 = arith.addf %28, %29 : vector<8x512xf32>
    %cst_12 = arith.constant 0.000000e+00 : f32
    %31 = vector.broadcast %cst_12 : f32 to vector<8x512xf32>
    %32 = arith.cmpf ogt, %30, %31 : vector<8x512xf32>
    %cst_13 = arith.constant 0.000000e+00 : f32
    %33 = vector.broadcast %cst_13 : f32 to vector<8x512xf32>
    %34 = arith.minimumf %30, %33 : vector<8x512xf32>
    %35 = math.exp %34 : vector<8x512xf32>
    %cst_14 = arith.constant 1.000000e+00 : f32
    %36 = vector.broadcast %cst_14 : f32 to vector<8x512xf32>
    %37 = arith.subf %35, %36 : vector<8x512xf32>
    %38 = arith.select %32, %30, %37 : vector<8x512xi1>, vector<8x512xf32>
    %c0_i32_15 = arith.constant 0 : i32
    %39 = tpu.memref_slice %arg9[%c0_i32_15] : memref<2x!tpu.dma_semaphore, #tpu.memory_space<semaphore_mem>> -> memref<1x!tpu.dma_semaphore, #tpu.memory_space<semaphore_mem>>
    %40 = tpu.memref_squeeze %39 : memref<1x!tpu.dma_semaphore, #tpu.memory_space<semaphore_mem>> -> memref<!tpu.dma_semaphore, #tpu.memory_space<semaphore_mem>>
    tpu.wait_dma2 semaphore(%40 : memref<!tpu.dma_semaphore, #tpu.memory_space<semaphore_mem>>) src(%arg4 : memref<512x512xbf16, #tpu.memory_space<any>>) dst(%arg7 : memref<512x512xbf16, #tpu.memory_space<vmem>>)
    %41 = arith.truncf %38 : vector<8x512xf32> to vector<8x512xbf16>
    %c0_16 = arith.constant 0 : index
    %c0_17 = arith.constant 0 : index
    %42 = vector.load %arg7[%c0_16, %c0_17] : memref<512x512xbf16, #tpu.memory_space<vmem>>, vector<512x512xbf16>
    %cst_18 = arith.constant dense<0.000000e+00> : vector<8x512xf32>
    %43 = tpu.matmul %41, %42, %cst_18 {dimension_numbers = #tpu.dot_dimension_numbers<[1], [0], [0], [1], [0, 0, 1, 1], [], []>} : vector<8x512xbf16>, vector<512x512xbf16>, vector<8x512xf32> -> vector<8x512xf32>
    %c3 = arith.constant 3 : index
    %c0_19 = arith.constant 0 : index
    %44 = vector.load %arg2[%c3, %c0_19] : memref<6x512xf32, #tpu.memory_space<vmem>>, vector<1x512xf32>
    %45 = vector.broadcast %44 : vector<1x512xf32> to vector<8x512xf32>
    %46 = arith.addf %43, %45 : vector<8x512xf32>
    %c4 = arith.constant 4 : index
    %c0_20 = arith.constant 0 : index
    %47 = vector.load %arg2[%c4, %c0_20] : memref<6x512xf32, #tpu.memory_space<vmem>>, vector<1x512xf32>
    %c5 = arith.constant 5 : index
    %c0_21 = arith.constant 0 : index
    %48 = vector.load %arg2[%c5, %c0_21] : memref<6x512xf32, #tpu.memory_space<vmem>>, vector<1x512xf32>
    %cst_22 = arith.constant dense<0.000000e+00> : vector<512xf32>
    %49 = vector.multi_reduction <add>, %46, %cst_22 [0] : vector<8x512xf32> to vector<512xf32>
    %50 = vector.shape_cast %49 : vector<512xf32> to vector<1x512xf32>
    %cst_23 = arith.constant 8.000000e+00 : f32
    %51 = vector.broadcast %cst_23 : f32 to vector<1x512xf32>
    %52 = arith.divf %50, %51 : vector<1x512xf32>
    %53 = vector.broadcast %52 : vector<1x512xf32> to vector<8x512xf32>
    %54 = arith.subf %46, %53 : vector<8x512xf32>
    %55 = arith.mulf %54, %54 : vector<8x512xf32>
    %cst_24 = arith.constant dense<0.000000e+00> : vector<512xf32>
    %56 = vector.multi_reduction <add>, %55, %cst_24 [0] : vector<8x512xf32> to vector<512xf32>
    %57 = vector.shape_cast %56 : vector<512xf32> to vector<1x512xf32>
    %cst_25 = arith.constant 8.000000e+00 : f32
    %58 = vector.broadcast %cst_25 : f32 to vector<1x512xf32>
    %59 = arith.divf %57, %58 : vector<1x512xf32>
    %cst_26 = arith.constant 9.99999974E-6 : f32
    %60 = vector.broadcast %cst_26 : f32 to vector<1x512xf32>
    %61 = arith.addf %59, %60 : vector<1x512xf32>
    %62 = math.rsqrt %61 : vector<1x512xf32>
    %63 = arith.mulf %47, %62 : vector<1x512xf32>
    %64 = vector.broadcast %63 : vector<1x512xf32> to vector<8x512xf32>
    %65 = arith.mulf %54, %64 : vector<8x512xf32>
    %66 = vector.broadcast %48 : vector<1x512xf32> to vector<8x512xf32>
    %67 = arith.addf %65, %66 : vector<8x512xf32>
    %cst_27 = arith.constant 0.000000e+00 : f32
    %68 = vector.broadcast %cst_27 : f32 to vector<8x512xf32>
    %69 = arith.cmpf ogt, %67, %68 : vector<8x512xf32>
    %cst_28 = arith.constant 0.000000e+00 : f32
    %70 = vector.broadcast %cst_28 : f32 to vector<8x512xf32>
    %71 = arith.minimumf %67, %70 : vector<8x512xf32>
    %72 = math.exp %71 : vector<8x512xf32>
    %cst_29 = arith.constant 1.000000e+00 : f32
    %73 = vector.broadcast %cst_29 : f32 to vector<8x512xf32>
    %74 = arith.subf %72, %73 : vector<8x512xf32>
    %75 = arith.select %69, %67, %74 : vector<8x512xi1>, vector<8x512xf32>
    %c1_i32_30 = arith.constant 1 : i32
    %76 = tpu.memref_slice %arg9[%c1_i32_30] : memref<2x!tpu.dma_semaphore, #tpu.memory_space<semaphore_mem>> -> memref<1x!tpu.dma_semaphore, #tpu.memory_space<semaphore_mem>>
    %77 = tpu.memref_squeeze %76 : memref<1x!tpu.dma_semaphore, #tpu.memory_space<semaphore_mem>> -> memref<!tpu.dma_semaphore, #tpu.memory_space<semaphore_mem>>
    tpu.wait_dma2 semaphore(%77 : memref<!tpu.dma_semaphore, #tpu.memory_space<semaphore_mem>>) src(%arg5 : memref<512x384xbf16, #tpu.memory_space<any>>) dst(%arg8 : memref<512x384xbf16, #tpu.memory_space<vmem>>)
    %78 = arith.truncf %75 : vector<8x512xf32> to vector<8x512xbf16>
    %c0_31 = arith.constant 0 : index
    %c0_32 = arith.constant 0 : index
    %79 = vector.load %arg8[%c0_31, %c0_32] : memref<512x384xbf16, #tpu.memory_space<vmem>>, vector<512x384xbf16>
    %cst_33 = arith.constant dense<0.000000e+00> : vector<8x384xf32>
    %80 = tpu.matmul %78, %79, %cst_33 {dimension_numbers = #tpu.dot_dimension_numbers<[1], [0], [0], [1], [0, 0, 1, 1], [], []>} : vector<8x512xbf16>, vector<512x384xbf16>, vector<8x384xf32> -> vector<8x384xf32>
    %c0_34 = arith.constant 0 : index
    %c0_35 = arith.constant 0 : index
    %81 = vector.load %arg3[%c0_34, %c0_35] : memref<1x384xf32, #tpu.memory_space<vmem>>, vector<1x384xf32>
    %82 = vector.broadcast %81 : vector<1x384xf32> to vector<8x384xf32>
    %83 = arith.addf %80, %82 : vector<8x384xf32>
    %c0_36 = arith.constant 0 : index
    %c0_37 = arith.constant 0 : index
    %84 = vector.load %arg6[%c0_36, %c0_37] : memref<8x384xf32, #tpu.memory_space<vmem>>, vector<8x384xf32>
    tpu.vector_store %arg6[%c0_36, %c0_37], %83 {strides = array<i32>} : memref<8x384xf32, #tpu.memory_space<vmem>>, vector<8x384xf32>,
    return
  }
}

</mosaic_0001>

<bundles_post_ra>
// kernel: encoder_forward.1
= control target key start
LH: loop header
LB: loop body
LE: loop exit
PB: predicated region body
PF: predicated region fallthrough
CT: control target
= control target key end

     0   :  { %11 = vsyncpa [#allocation6], 0  ;;  %s3418_s0 = inlined_call_operand.vmem [shape: bf16[8,64], index: 0, kind: input, shape index: {}]   ;;  %s3419_s1 = inlined_call_operand.hbm [shape: bf16[64,512], index: 1, kind: input, shape index: {}]   ;;  %s3420_s2 = inlined_call_operand.hbm [shape: f32[6,512], index: 2, kind: input, shape index: {}]   ;;  %s3421_s3 = inlined_call_operand.vmem [shape: f32[1,384], index: 3, kind: input, shape index: {}]   ;;  %s3422_s4 = inlined_call_operand.hbm [shape: bf16[512,512], index: 4, kind: input, shape index: {}]   ;;  %s3423_s5 = inlined_call_operand.hbm [shape: bf16[512,384], index: 5, kind: input, shape index: {}]   ;;  %s3424_s6 = inlined_call_operand.vmem [shape: f32[8,384], index: 6, kind: output, shape index: {}]  }
   0x1   :  { %12 = vsyncpa [#allocation8], 0  ;;  %s3214_s21 = smov [#allocation5]  }
   0x2   :  { %s20_s22 = sshll.u32 %s3214_s21, 4  ;;  %s21_s22 = int_to_ptr.vmem [resolvable:$true] %s20_s22 }
   0x3   :  { %s3134_s23 = scalar_lea.vmem %s21_s22, 2048  ;;  %p3139_p1 = scmp.lt.s32.totalorder %s21_s22, %s21_s22 }
   0x4   :  { %p3135_p0 = scmp.ne.s32.totalorder %s21_s22, %s3134_s23  ;;  %p3140_p2 = scmp.lt.s32.totalorder %s3134_s23, %s3134_s23 }
   0x6   :  { %p3141_p3 = por %p3140_p2, %p3139_p1 }
   0x8   :  { %p3142_p4 = pnand %p3141_p3, %p3135_p0 }
   0xa   :  { %3145 = shalt.err (!%p3142_p4)
}
   0xb   :  { %s3215_s24 = smov 256   ;;  %s3216_s25 = smov 16  }
   0xc   :  { %26 = dma.hbm_to_vmem [thread:$0]  %s3419_s1, 2048, %s21_s22, [#allocation6], %s3215_s24, %s3215_s24, %s3216_s25  }
   0xd   :  { %s3217_s28 = smov [#allocation7]  }
   0xe   :  { %s33_s29 = sshll.u32 %s3217_s28, 4  ;;  %s34_s29 = int_to_ptr.vmem [resolvable:$true] %s33_s29 }
   0xf   :  { %s3154_s30 = scalar_lea.vmem %s34_s29, 512  ;;  %p3159_p6 = scmp.lt.s32.totalorder %s34_s29, %s34_s29 }
  0x10   :  { %p3155_p5 = scmp.ne.s32.totalorder %s34_s29, %s3154_s30  ;;  %p3160_p7 = scmp.lt.s32.totalorder %s3154_s30, %s3154_s30 }
  0x12   :  { %p3161_p8 = por %p3160_p7, %p3159_p6 }
  0x14   :  { %p3162_p9 = pnand %p3161_p8, %p3155_p5 }
  0x16   :  { %3165 = shalt.err (!%p3162_p9)
}
  0x17   :  { %36 = dma.hbm_to_vmem [thread:$0]  %s3420_s2, 512, %s34_s29, [#allocation8]  }
  0x18   :  { %3206 = dma.done.wait [#allocation6], 2048  }
  0x19   :  { %3207 = vsyncadd [#allocation6], 4294965248 }
  0x1a   :  { %3208 = dma.done.wait [#allocation8], 512  }
  0x1b   :  { %3209 = vsyncadd [#allocation8], 4294966784  ;;  %v3218_v0 = vmov 0   ;;  %v2750_v1 = vld [vmem:[#allocation5 + $0x64] ss:$16 sps:$4 sm:$0xff]   ;;  %vm188_vm0 = vcmask 523264  }
  0x1c   :  { %224 = vmatprep.mubr.bf16.mxu0 %v3218_v0  ;;  %265 = vmatprep.mubr.bf16.mxu1 %v3218_v0  ;;  %v2752_v2 = vld [vmem:[#allocation5 + $0x6c] ss:$16 sps:$4 sm:$0xff]   ;;  %v2754_v3 = vld [vmem:[#allocation5 + $0x60] ss:$16 sps:$4 sm:$0xff]   ;;  %v2755_v4 = vld [vmem:[#allocation5 + $0x68] ss:$16 sps:$4 sm:$0xff]  }
  0x1d   :  { %200 = vmatprep.subr.bf16.mxu0 %v2750_v1  ;;  %241 = vmatprep.subr.bf16.mxu1 %v2752_v2  ;;  %v2756_v5 = vld [vmem:[#allocation5 + $0x44] ss:$16 sps:$4 sm:$0xff]   ;;  %v2758_v6 = vld [vmem:[#allocation5 + $0x4c] ss:$16 sps:$4 sm:$0xff]   ;;  %v2760_v7 = vld [vmem:[#allocation5 + $0x40] ss:$16 sps:$4 sm:$0xff]  }
  0x1e   :  { %201 = vmatpush1.bf16.msra.mxu0 %v2754_v3  ;;  %242 = vmatpush1.bf16.msra.mxu1 %v2755_v4  ;;  %v2761_v8 = vld [vmem:[#allocation5 + $0x48] ss:$16 sps:$4 sm:$0xff]   ;;  %v2762_v9 = vld [vmem:[#allocation5 + $0x24] ss:$16 sps:$4 sm:$0xff]   ;;  %v2764_v10 = vld [vmem:[#allocation5 + $0x2c] ss:$16 sps:$4 sm:$0xff]  }
  0x1f   :  { %202 = vmatprep.subr.bf16.mxu0 %v2756_v5  ;;  %243 = vmatprep.subr.bf16.mxu1 %v2758_v6  ;;  %v2766_v11 = vld [vmem:[#allocation5 + $0x20] ss:$16 sps:$4 sm:$0xff]   ;;  %v2767_v12 = vld [vmem:[#allocation5 + $0x28] ss:$16 sps:$4 sm:$0xff]   ;;  %v2768_v13 = vld [vmem:[#allocation5 + $0x4] ss:$16 sps:$4 sm:$0xff]  }
  0x20   :  { %v2770_v14 = vld [vmem:[#allocation5 + $0xc] ss:$16 sps:$4 sm:$0xff]   ;;  %v2772_v15 = vld [vmem:[#allocation5] ss:$16 sps:$4 sm:$0xff]   ;;  %v2773_v16 = vld [vmem:[#allocation5 + $0x8] ss:$16 sps:$4 sm:$0xff]  }
  0x21   :  { %v57_v17 = vld [vmem:[%s3418_s0] sm:$0xf]  ;;  %s3219_s9 = smov [#allocation2]   ;;  %s3220_s11 = smov [#allocation3]  }
  0x22   :  { %203 = vmatpush1.bf16.msra.mxu0 %v2760_v7  ;;  %244 = vmatpush1.bf16.msra.mxu1 %v2761_v8  ;;  %s53_s10 = sshll.u32 %s3219_s9, 4  ;;  %s82_s12 = sshll.u32 %s3220_s11, 4  ;;  %s54_s10 = int_to_ptr.vmem [resolvable:$true] %s53_s10  ;;  %s83_s12 = int_to_ptr.vmem [resolvable:$true] %s82_s12 }
  0x23   :  { %204 = vmatprep.subr.bf16.mxu0 %v2762_v9  ;;  %245 = vmatprep.subr.bf16.mxu1 %v2764_v10  ;;  %s3174_s13 = scalar_lea.vmem %s54_s10, 16384  ;;  %p3179_p11 = scmp.lt.s32.totalorder %s54_s10, %s54_s10 }
  0x24   :  { %p3175_p10 = scmp.ne.s32.totalorder %s54_s10, %s3174_s13  ;;  %p3180_p12 = scmp.lt.s32.totalorder %s3174_s13, %s3174_s13 }
  0x26   :  { %205 = vmatpush1.bf16.msra.mxu0 %v2766_v11  ;;  %246 = vmatpush1.bf16.msra.mxu1 %v2767_v12  ;;  %p3181_p13 = por %p3180_p12, %p3179_p11 }
  0x27   :  { %206 = vmatprep.subr.bf16.mxu0 %v2768_v13  ;;  %247 = vmatprep.subr.bf16.mxu1 %v2770_v14 }
  0x28   :  { %p3182_p0 = pnand %p3181_p13, %p3175_p10 }
  0x2a   :  { %207 = vmatpush1.bf16.msra.mxu0 %v2772_v15  ;;  %248 = vmatpush1.bf16.msra.mxu1 %v2773_v16 }
  0x2d   :  { %2462 = vmatmul.mubr.msk.bf16.vlgmr.msra.gmra.mxu0 %vm188_vm0, %v57_v17  ;;  %2463 = vmatmul.mubr.msk.bf16.vlgmr.msra.gmra.mxu1 %vm188_vm0, %v57_v17 }
  0x2e   :  { %3185 = shalt.err (!%p3182_p0)  }
  0x2f   :  { %56 = dma.hbm_to_vmem [thread:$0]  %s3422_s4, 16384, %s54_s10, [#allocation4] }
  0x30   :  { %s3194_s0 = scalar_lea.vmem %s83_s12, 12288  ;;  %p3199_p2 = scmp.lt.s32.totalorder %s83_s12, %s83_s12 }
  0x31   :  { %p3195_p1 = scmp.ne.s32.totalorder %s83_s12, %s3194_s0  ;;  %p3200_p3 = scmp.lt.s32.totalorder %s3194_s0, %s3194_s0 }
  0x33   :  { %p3201_p4 = por %p3200_p3, %p3199_p2 }
  0x35   :  { %p3202_p5 = pnand %p3201_p4, %p3195_p1 }
  0x37   :  { %3205 = shalt.err (!%p3202_p5)  }
  0x38   :  { %85 = dma.hbm_to_vmem [thread:$0]  %s3423_s5, 12288, %s83_s12, [#allocation4 + $0x1]  ;;  %v88_v18 = vlaneseq  ;;  %v86_v22 = vld [vmem:[#allocation7] ss:$8 sm:$0xf] }
  0x3a   :  { %v3272_v19 = vshrl.u32 %v88_v18, 7 }
  0x3c   :  { %v3275_v20 = vsub.s32 0, %v3272_v19  ;;  %v3278_v21 = vsub.s32 2, %v3272_v19  ;;  %v3281_v23 = vsub.s32 1, %v3272_v19  ;;  %v3284_v24 = vsub.s32 3, %v3272_v19 }
  0x3e   :  { %v91_v25 = vrot.slane %v86_v22, %v3275_v20  ;;  %v99_v26 = vrot.slane %v86_v22, %v3278_v21  ;;  %v95_v27 = vrot.slane %v86_v22, %v3281_v23  ;;  %v103_v28 = vrot.slane %v86_v22, %v3284_v24 }
  0xed   :  { %v226_v29 = vpop.f32.mrf.mxu0  ;;  %v267_v30 = vpop.f32.mrf.mxu1 }
  0xee   :  { %v227_v31 = vadd.f32 %v226_v29, %v91_v25  ;;  %v268_v32 = vadd.f32 %v267_v30, %v99_v26 }
  0xef   :  { %v228_v33 = vpop.f32.mrf.mxu0  ;;  %v269_v34 = vpop.f32.mrf.mxu1 }
  0xf0   :  { %v278_v35 = vrot.slane %v227_v31, 4  ;;  %v290_v36 = vrot.slane %v268_v32, 4  ;;  %v229_v37 = vadd.f32 %v228_v33, %v95_v27  ;;  %v270_v38 = vadd.f32 %v269_v34, %v103_v28 }
  0xf1   :  { %v230_v39 = vpop.f32.mrf.mxu0  ;;  %v271_v40 = vpop.f32.mrf.mxu1 }
  0xf2   :  { %v279_v41 = vadd.f32 %v278_v35, %v227_v31  ;;  %v291_v42 = vadd.f32 %v290_v36, %v268_v32  ;;  %v284_v43 = vrot.slane %v229_v37, 4  ;;  %v296_v44 = vrot.slane %v270_v38, 4 }
  0xf3   :  { %v231_v45 = vpop.f32.mrf.mxu0  ;;  %v272_v46 = vpop.f32.mrf.mxu1 }
  0xf4   :  { %v280_v47 = vrot.slane %v279_v41, 2  ;;  %v292_v48 = vrot.slane %v291_v42, 2  ;;  %v285_v49 = vadd.f32 %v284_v43, %v229_v37  ;;  %v297_v50 = vadd.f32 %v296_v44, %v270_v38 }
  0xf6   :  { %v281_v51 = vadd.f32 %v280_v47, %v279_v41  ;;  %v293_v52 = vadd.f32 %v292_v48, %v291_v42  ;;  %v286_v53 = vrot.slane %v285_v49, 2  ;;  %v298_v54 = vrot.slane %v297_v50, 2 }
  0xf8   :  { %v282_v55 = vrot.slane %v281_v51, 1  ;;  %v294_v56 = vrot.slane %v293_v52, 1  ;;  %v287_v57 = vadd.f32 %v286_v53, %v285_v49  ;;  %v299_v58 = vadd.f32 %v298_v54, %v297_v50 }
  0xf9   :  { %v3221_v50 = vmov 1966171168  }
  0xfa   :  { %v283_v59 = vadd.f32 %v282_v55, %v281_v51  ;;  %v295_v60 = vadd.f32 %v294_v56, %v293_v52  ;;  %v288_v61 = vrot.slane %v287_v57, 1  ;;  %v300_v62 = vrot.slane %v299_v58, 1 }
  0xfb   :  { %v358_v51 = vunpack.c.l.s4 %v3221_v50 }
  0xfc   :  { %v303_v63 = vmul.f32 0.125, %v283_v59  ;;  %v305_v0 = vmul.f32 0.125, %v295_v60  ;;  %v289_v1 = vadd.f32 %v288_v61, %v287_v57  ;;  %v301_v2 = vadd.f32 %v300_v62, %v299_v58 }
  0xfd   :  { %v359_v52 = vunpack.c.0.s8 %v358_v51 }
  0xfe   :  { %v3290_v3 = vsub.f32 %v227_v31, %v303_v63  ;;  %v3292_v4 = vsub.f32 %v268_v32, %v305_v0  ;;  %v304_v5 = vmul.f32 0.125, %v289_v1  ;;  %v306_v6 = vmul.f32 0.125, %v301_v2  ;;  %v275_v63 = vld [vmem:[#allocation7 + $0x1] ss:$8 sm:$0xf] }
  0xff   :  { %v3307_v55 = vsub.s32 %v359_v52, %v3272_v19  ;;  %v277_v0 = vld [vmem:[#allocation7 + $0x2] ss:$8 sm:$0xf] }
 0x100   :  { %v311_v7 = vmul.f32 %v3290_v3, %v3290_v3  ;;  %v313_v8 = vmul.f32 %v3292_v4, %v3292_v4  ;;  %v3298_v9 = vsub.f32 %v229_v37, %v304_v5  ;;  %v3300_v10 = vsub.f32 %v270_v38, %v306_v6 }
 0x101   :  { %v410_v5 = vrot.slane %v277_v0, %v3275_v20  ;;  %v418_v6 = vrot.slane %v277_v0, %v3278_v21  ;;  %v414_v19 = vrot.slane %v277_v0, %v3281_v23 }
 0x102   :  { %v315_v11 = vrot.slane %v311_v7, 4  ;;  %v327_v12 = vrot.slane %v313_v8, 4  ;;  %v312_v13 = vmul.f32 %v3298_v9, %v3298_v9  ;;  %v314_v14 = vmul.f32 %v3300_v10, %v3300_v10 }
 0x104   :  { %v316_v15 = vadd.f32 %v315_v11, %v311_v7  ;;  %v328_v16 = vadd.f32 %v327_v12, %v313_v8  ;;  %v321_v17 = vrot.slane %v312_v13, 4  ;;  %v333_v18 = vrot.slane %v314_v14, 4 }
 0x105   :  { %v422_v7 = vrot.slane %v277_v0, %v3284_v24 }
 0x106   :  { %v317_v22 = vrot.slane %v316_v15, 2  ;;  %v329_v25 = vrot.slane %v328_v16, 2  ;;  %v322_v26 = vadd.f32 %v321_v17, %v312_v13  ;;  %v334_v27 = vadd.f32 %v333_v18, %v314_v14 }
 0x108   :  { %v318_v28 = vadd.f32 %v317_v22, %v316_v15  ;;  %v330_v29 = vadd.f32 %v329_v25, %v328_v16  ;;  %v323_v30 = vrot.slane %v322_v26, 2  ;;  %v335_v31 = vrot.slane %v334_v27, 2 }
 0x10a   :  { %v319_v32 = vrot.slane %v318_v28, 1  ;;  %v331_v33 = vrot.slane %v330_v29, 1  ;;  %v324_v34 = vadd.f32 %v323_v30, %v322_v26  ;;  %v336_v35 = vadd.f32 %v335_v31, %v334_v27 }
 0x10c   :  { %v320_v36 = vadd.f32 %v319_v32, %v318_v28  ;;  %v332_v37 = vadd.f32 %v331_v33, %v330_v29  ;;  %v325_v38 = vrot.slane %v324_v34, 1  ;;  %v337_v39 = vrot.slane %v336_v35, 1 }
 0x10e   :  { %v339_v40 = vmul.f32 0.125, %v320_v36  ;;  %v341_v41 = vmul.f32 0.125, %v332_v37  ;;  %v326_v42 = vadd.f32 %v325_v38, %v324_v34  ;;  %v338_v43 = vadd.f32 %v337_v39, %v336_v35 }
 0x110   :  { %v343_v44 = vadd.f32 1e-05, %v339_v40  ;;  %v345_v45 = vadd.f32 1e-05, %v341_v41  ;;  %v340_v46 = vmul.f32 0.125, %v326_v42  ;;  %v342_v47 = vmul.f32 0.125, %v338_v43 }
 0x112   :  { %2774 = vrsqrt.f32 %v343_v44  ;;  %v344_v48 = vadd.f32 1e-05, %v340_v46  ;;  %v346_v49 = vadd.f32 1e-05, %v342_v47 }
 0x113   :  { %2776 = vrsqrt.f32 %v345_v45 }
 0x114   :  { %2778 = vrsqrt.f32 %v344_v48 }
 0x115   :  { %2780 = vrsqrt.f32 %v346_v49 }
 0x11f   :  { %v2775_v53 = vpop.eup %2774 }
 0x120   :  { %v2777_v54 = vpop.eup %2776 }
 0x121   :  { %v2779_v56 = vpop.eup %2778 }
 0x122   :  { %v2781_v57 = vpop.eup %2780  ;;  %v355_v58 = vcombine.low %v2775_v53, %v2779_v56 }
 0x123   :  { %v356_v59 = vcombine.low %v2777_v54, %v2781_v57 }
 0x124   :  { %v363_v60 = vrot.slane %v355_v58, %v3307_v55 }
 0x125   :  { %v370_v61 = vrot.slane %v356_v59, %v3307_v55 }
 0x127   :  { %v371_v62 = vcombine.low %v363_v60, %v370_v61 }
 0x129   :  { %v378_v1 = vrot.slane %v371_v62, %v3307_v55 }
 0x12b   :  { %v380_v2 = vmul.f32 %v378_v1, %v275_v63 }
 0x12d   :  { %v385_v8 = vrot.slane %v380_v2, %v3275_v20  ;;  %v389_v11 = vrot.slane %v380_v2, %v3281_v23  ;;  %v393_v12 = vrot.slane %v380_v2, %v3278_v21  ;;  %v397_v13 = vrot.slane %v380_v2, %v3284_v24 }
 0x12f   :  { %v402_v14 = vmul.f32 %v385_v8, %v3290_v3  ;;  %v403_v15 = vmul.f32 %v389_v11, %v3298_v9  ;;  %v404_v16 = vmul.f32 %v393_v12, %v3292_v4  ;;  %v405_v17 = vmul.f32 %v397_v13, %v3300_v10 }
 0x131   :  { %v427_v18 = vadd.f32 %v410_v5, %v402_v14  ;;  %v428_v22 = vadd.f32 %v414_v19, %v403_v15  ;;  %v429_v25 = vadd.f32 %v418_v6, %v404_v16  ;;  %v430_v26 = vadd.f32 %v422_v7, %v405_v17 }
 0x133   :  { %v435_v27 = vmin.f32 %v427_v18, 0.0  ;;  %v436_v28 = vmin.f32 %v428_v22, 0.0  ;;  %v437_v29 = vmin.f32 %v429_v25, 0.0  ;;  %v438_v30 = vmin.f32 %v430_v26, 0.0 }
 0x134   :  { %vm431_vm1 = vcmp.gt.f32.partialorder %v427_v18, 0.0  ;;  %vm432_vm2 = vcmp.gt.f32.partialorder %v428_v22, 0.0  ;;  %vm433_vm3 = vcmp.gt.f32.partialorder %v429_v25, 0.0  ;;  %vm434_vm4 = vcmp.gt.f32.partialorder %v430_v26, 0.0 }
 0x135   :  { %v439_v31 = vmul.f32 1.442695, %v435_v27  ;;  %v441_v32 = vmul.f32 1.442695, %v436_v28  ;;  %v443_v33 = vmul.f32 1.442695, %v437_v29 }
 0x136   :  { %v445_v34 = vmul.f32 1.442695, %v438_v30 }
 0x137   :  { %2782 = vpow2.f32 %v439_v31 }
 0x138   :  { %2784 = vpow2.f32 %v441_v32 }
 0x139   :  { %2786 = vpow2.f32 %v443_v33 }
 0x13a   :  { %2788 = vpow2.f32 %v445_v34 }
 0x144   :  { %v2783_v3 = vpop.eup %2782 }
 0x145   :  { %v2785_v4 = vpop.eup %2784  ;;  %v2464_v9 = vadd.f32 -1.0, %v2783_v3 }
 0x146   :  { %v2787_v10 = vpop.eup %2786  ;;  %v2465_v35 = vadd.f32 -1.0, %v2785_v4 }
 0x147   :  { %v2789_v36 = vpop.eup %2788  ;;  %v2466_v37 = vadd.f32 -1.0, %v2787_v10  ;;  %v3324_v38 = vsel %vm431_vm1, %v427_v18, %v2464_v9 }
 0x148   :  { %v2467_v39 = vadd.f32 -1.0, %v2789_v36  ;;  %v452_v40 = vsel %vm432_vm2, %v428_v22, %v2465_v35 }
 0x149   :  { %v3326_v41 = vsel %vm433_vm3, %v429_v25, %v2466_v37 }
 0x14a   :  { %v454_v42 = vsel %vm434_vm4, %v430_v26, %v2467_v39 }
 0x14b   :  { %3210 = dma.done.wait [#allocation4], 16384 }
 0x14c   :  { %3211 = vsyncadd [#allocation4], 4294950912  ;;  %v3328_v43 = vpack.c.bf16 %v452_v40, %v452_v40  ;;  %v3330_v44 = vpack.c.bf16 %v454_v42, %v454_v42  ;;  %v2790_v45 = vld [vmem:[#allocation2 + $0xe4] ss:$16 sps:$4 sm:$0xff]   ;;  %v2794_v47 = vld [vmem:[#allocation2 + $0xe0] ss:$16 sps:$4 sm:$0xff]  }
 0x14d   :  { %v2792_v46 = vld [vmem:[#allocation2 + $0x2e4] ss:$16 sps:$4 sm:$0xff]   ;;  %1254 = vmatprep.subr.bf16.mxu0 %v2790_v45  ;;  %v2795_v48 = vld [vmem:[#allocation2 + $0x2e0] ss:$16 sps:$4 sm:$0xff]  }
 0x14e   :  { %1286 = vmatprep.mubr.bf16.mxu0 %v3328_v43  ;;  %1327 = vmatprep.mubr.bf16.mxu1 %v3330_v44  ;;  %v2796_v49 = vld [vmem:[#allocation2 + $0xc4] ss:$16 sps:$4 sm:$0xff]   ;;  %v2800_v51 = vld [vmem:[#allocation2 + $0xc0] ss:$16 sps:$4 sm:$0xff]  }
 0x14f   :  { %1295 = vmatprep.subr.bf16.mxu1 %v2792_v46  ;;  %1255 = vmatpush1.bf16.msra.mxu0 %v2794_v47  ;;  %v2798_v50 = vld [vmem:[#allocation2 + $0x2c4] ss:$16 sps:$4 sm:$0xff]   ;;  %v2801_v52 = vld [vmem:[#allocation2 + $0x2c0] ss:$16 sps:$4 sm:$0xff]  }
 0x150   :  { %1296 = vmatpush1.bf16.msra.mxu1 %v2795_v48  ;;  %1256 = vmatprep.subr.bf16.mxu0 %v2796_v49  ;;  %v2802_v53 = vld [vmem:[#allocation2 + $0xa4] ss:$16 sps:$4 sm:$0xff]   ;;  %v2806_v56 = vld [vmem:[#allocation2 + $0xa0] ss:$16 sps:$4 sm:$0xff]  }
 0x151   :  { %1297 = vmatprep.subr.bf16.mxu1 %v2798_v50  ;;  %v2804_v54 = vld [vmem:[#allocation2 + $0x2a4] ss:$16 sps:$4 sm:$0xff]   ;;  %v2807_v57 = vld [vmem:[#allocation2 + $0x2a0] ss:$16 sps:$4 sm:$0xff]  }
 0x152   :  { %v2808_v58 = vld [vmem:[#allocation2 + $0x84] ss:$16 sps:$4 sm:$0xff]   ;;  %v2812_v60 = vld [vmem:[#allocation2 + $0x80] ss:$16 sps:$4 sm:$0xff]  }
 0x153   :  { %1257 = vmatpush1.bf16.msra.mxu0 %v2800_v51  ;;  %v2810_v59 = vld [vmem:[#allocation2 + $0x284] ss:$16 sps:$4 sm:$0xff]   ;;  %v2813_v61 = vld [vmem:[#allocation2 + $0x280] ss:$16 sps:$4 sm:$0xff]  }
 0x154   :  { %1298 = vmatpush1.bf16.msra.mxu1 %v2801_v52  ;;  %1258 = vmatprep.subr.bf16.mxu0 %v2802_v53  ;;  %v2814_v62 = vld [vmem:[#allocation2 + $0x64] ss:$16 sps:$4 sm:$0xff]   ;;  %v2818_v0 = vld [vmem:[#allocation2 + $0x60] ss:$16 sps:$4 sm:$0xff]  }
 0x155   :  { %1299 = vmatprep.subr.bf16.mxu1 %v2804_v54  ;;  %v2816_v63 = vld [vmem:[#allocation2 + $0x264] ss:$16 sps:$4 sm:$0xff]   ;;  %v2819_v1 = vld [vmem:[#allocation2 + $0x260] ss:$16 sps:$4 sm:$0xff]   ;;  %v2888_v54 = vld [vmem:[#allocation2 + $0xec] ss:$16 sps:$4 sm:$0xff]  }
 0x156   :  { %v2820_v2 = vld [vmem:[#allocation2 + $0x44] ss:$16 sps:$4 sm:$0xff]   ;;  %v2824_v6 = vld [vmem:[#allocation2 + $0x40] ss:$16 sps:$4 sm:$0xff]  }
 0x157   :  { %1259 = vmatpush1.bf16.msra.mxu0 %v2806_v56  ;;  %v2822_v5 = vld [vmem:[#allocation2 + $0x244] ss:$16 sps:$4 sm:$0xff]   ;;  %v2825_v19 = vld [vmem:[#allocation2 + $0x240] ss:$16 sps:$4 sm:$0xff]   ;;  %v2891_v56 = vld [vmem:[#allocation2 + $0x2ec] ss:$16 sps:$4 sm:$0xff]  }
 0x158   :  { %1300 = vmatpush1.bf16.msra.mxu1 %v2807_v57  ;;  %1260 = vmatprep.subr.bf16.mxu0 %v2808_v58  ;;  %v2826_v7 = vld [vmem:[#allocation2 + $0x24] ss:$16 sps:$4 sm:$0xff]   ;;  %v2830_v11 = vld [vmem:[#allocation2 + $0x20] ss:$16 sps:$4 sm:$0xff]   ;;  %v3336_v57 = vpack.c.bf16 %v3324_v38, %v3324_v38  ;;  %v3340_v58 = vpack.c.bf16 %v3326_v41, %v3326_v41  ;;  %v2900_v38 = vld [vmem:[#allocation2 + $0xac] ss:$16 sps:$4 sm:$0xff]  }
 0x159   :  { %1301 = vmatprep.subr.bf16.mxu1 %v2810_v59  ;;  %v2828_v8 = vld [vmem:[#allocation2 + $0x224] ss:$16 sps:$4 sm:$0xff]   ;;  %v2831_v12 = vld [vmem:[#allocation2 + $0x220] ss:$16 sps:$4 sm:$0xff]   ;;  %v2886_v59 = vld [vmem:[#allocation2 + $0xe8] ss:$16 sps:$4 sm:$0xff]  }
 0x15a   :  { %v2832_v13 = vld [vmem:[#allocation2 + $0x4] ss:$16 sps:$4 sm:$0xff]   ;;  %v2836_v15 = vld [vmem:[#allocation2] ss:$16 sps:$4 sm:$0xff]   ;;  %v2903_v41 = vld [vmem:[#allocation2 + $0x2ac] ss:$16 sps:$4 sm:$0xff]  }
 0x15b   :  { %1261 = vmatpush1.bf16.msra.mxu0 %v2812_v60  ;;  %v2834_v14 = vld [vmem:[#allocation2 + $0x204] ss:$16 sps:$4 sm:$0xff]   ;;  %v2837_v16 = vld [vmem:[#allocation2 + $0x200] ss:$16 sps:$4 sm:$0xff]   ;;  %v2889_v60 = vld [vmem:[#allocation2 + $0x2e8] ss:$16 sps:$4 sm:$0xff]  }
 0x15c   :  { %1302 = vmatpush1.bf16.msra.mxu1 %v2813_v61  ;;  %1262 = vmatprep.subr.bf16.mxu0 %v2814_v62  ;;  %v2838_v17 = vld [vmem:[#allocation2 + $0x1e4] ss:$16 sps:$4 sm:$0xff]   ;;  %v2842_v22 = vld [vmem:[#allocation2 + $0x1e0] ss:$16 sps:$4 sm:$0xff]   ;;  %v2894_v61 = vld [vmem:[#allocation2 + $0xcc] ss:$16 sps:$4 sm:$0xff]  }
 0x15d   :  { %1303 = vmatprep.subr.bf16.mxu1 %v2816_v63  ;;  %v2840_v18 = vld [vmem:[#allocation2 + $0x3e4] ss:$16 sps:$4 sm:$0xff]   ;;  %v2843_v25 = vld [vmem:[#allocation2 + $0x3e0] ss:$16 sps:$4 sm:$0xff]   ;;  %v2897_v62 = vld [vmem:[#allocation2 + $0x2cc] ss:$16 sps:$4 sm:$0xff]  }
 0x15e   :  { %v2844_v26 = vld [vmem:[#allocation2 + $0x1c4] ss:$16 sps:$4 sm:$0xff]   ;;  %v2848_v28 = vld [vmem:[#allocation2 + $0x1c0] ss:$16 sps:$4 sm:$0xff]   ;;  %v2892_v63 = vld [vmem:[#allocation2 + $0xc8] ss:$16 sps:$4 sm:$0xff]  }
 0x15f   :  { %1263 = vmatpush1.bf16.msra.mxu0 %v2818_v0  ;;  %v2846_v27 = vld [vmem:[#allocation2 + $0x3c4] ss:$16 sps:$4 sm:$0xff]   ;;  %v2849_v29 = vld [vmem:[#allocation2 + $0x3c0] ss:$16 sps:$4 sm:$0xff]   ;;  %v2895_v0 = vld [vmem:[#allocation2 + $0x2c8] ss:$16 sps:$4 sm:$0xff]  }
 0x160   :  { %1304 = vmatpush1.bf16.msra.mxu1 %v2819_v1  ;;  %1264 = vmatprep.subr.bf16.mxu0 %v2820_v2  ;;  %v2850_v30 = vld [vmem:[#allocation2 + $0x1a4] ss:$16 sps:$4 sm:$0xff]   ;;  %v2854_v32 = vld [vmem:[#allocation2 + $0x1a0] ss:$16 sps:$4 sm:$0xff]   ;;  %v2898_v1 = vld [vmem:[#allocation2 + $0xa8] ss:$16 sps:$4 sm:$0xff]  }
 0x161   :  { %1305 = vmatprep.subr.bf16.mxu1 %v2822_v5  ;;  %v2852_v31 = vld [vmem:[#allocation2 + $0x3a4] ss:$16 sps:$4 sm:$0xff]   ;;  %v2855_v33 = vld [vmem:[#allocation2 + $0x3a0] ss:$16 sps:$4 sm:$0xff]   ;;  %v2901_v2 = vld [vmem:[#allocation2 + $0x2a8] ss:$16 sps:$4 sm:$0xff]  }
 0x162   :  { %v2856_v34 = vld [vmem:[#allocation2 + $0x184] ss:$16 sps:$4 sm:$0xff]   ;;  %v2860_v4 = vld [vmem:[#allocation2 + $0x180] ss:$16 sps:$4 sm:$0xff]   ;;  %v2906_v5 = vld [vmem:[#allocation2 + $0x8c] ss:$16 sps:$4 sm:$0xff]  }
 0x163   :  { %1265 = vmatpush1.bf16.msra.mxu0 %v2824_v6  ;;  %v2858_v3 = vld [vmem:[#allocation2 + $0x384] ss:$16 sps:$4 sm:$0xff]   ;;  %v2861_v9 = vld [vmem:[#allocation2 + $0x380] ss:$16 sps:$4 sm:$0xff]   ;;  %v2909_v6 = vld [vmem:[#allocation2 + $0x28c] ss:$16 sps:$4 sm:$0xff]  }
 0x164   :  { %1306 = vmatpush1.bf16.msra.mxu1 %v2825_v19  ;;  %1266 = vmatprep.subr.bf16.mxu0 %v2826_v7  ;;  %v2862_v10 = vld [vmem:[#allocation2 + $0x164] ss:$16 sps:$4 sm:$0xff]   ;;  %v2866_v36 = vld [vmem:[#allocation2 + $0x160] ss:$16 sps:$4 sm:$0xff]   ;;  %v2904_v19 = vld [vmem:[#allocation2 + $0x88] ss:$16 sps:$4 sm:$0xff]  }
 0x165   :  { %1307 = vmatprep.subr.bf16.mxu1 %v2828_v8  ;;  %v2864_v35 = vld [vmem:[#allocation2 + $0x364] ss:$16 sps:$4 sm:$0xff]   ;;  %v2867_v37 = vld [vmem:[#allocation2 + $0x360] ss:$16 sps:$4 sm:$0xff]   ;;  %v2907_v7 = vld [vmem:[#allocation2 + $0x288] ss:$16 sps:$4 sm:$0xff]  }
 0x166   :  { %v2868_v39 = vld [vmem:[#allocation2 + $0x144] ss:$16 sps:$4 sm:$0xff]   ;;  %v2872_v42 = vld [vmem:[#allocation2 + $0x140] ss:$16 sps:$4 sm:$0xff]   ;;  %v2912_v8 = vld [vmem:[#allocation2 + $0x6c] ss:$16 sps:$4 sm:$0xff]  }
 0x167   :  { %1267 = vmatpush1.bf16.msra.mxu0 %v2830_v11  ;;  %v2870_v40 = vld [vmem:[#allocation2 + $0x344] ss:$16 sps:$4 sm:$0xff]   ;;  %v2873_v45 = vld [vmem:[#allocation2 + $0x340] ss:$16 sps:$4 sm:$0xff]   ;;  %v2915_v11 = vld [vmem:[#allocation2 + $0x26c] ss:$16 sps:$4 sm:$0xff]  }
 0x168   :  { %1308 = vmatpush1.bf16.msra.mxu1 %v2831_v12  ;;  %1268 = vmatprep.subr.bf16.mxu0 %v2832_v13  ;;  %v2874_v46 = vld [vmem:[#allocation2 + $0x124] ss:$16 sps:$4 sm:$0xff]   ;;  %v2878_v48 = vld [vmem:[#allocation2 + $0x120] ss:$16 sps:$4 sm:$0xff]   ;;  %v2910_v12 = vld [vmem:[#allocation2 + $0x68] ss:$16 sps:$4 sm:$0xff]  }
 0x169   :  { %1309 = vmatprep.subr.bf16.mxu1 %v2834_v14  ;;  %v2876_v47 = vld [vmem:[#allocation2 + $0x324] ss:$16 sps:$4 sm:$0xff]   ;;  %v2879_v49 = vld [vmem:[#allocation2 + $0x320] ss:$16 sps:$4 sm:$0xff]   ;;  %v2921_v13 = vld [vmem:[#allocation2 + $0x24c] ss:$16 sps:$4 sm:$0xff]  }
 0x16a   :  { %v2880_v50 = vld [vmem:[#allocation2 + $0x104] ss:$16 sps:$4 sm:$0xff]   ;;  %v2884_v52 = vld [vmem:[#allocation2 + $0x100] ss:$16 sps:$4 sm:$0xff]   ;;  %v2916_v14 = vld [vmem:[#allocation2 + $0x48] ss:$16 sps:$4 sm:$0xff]  }
 0x16b   :  { %1269 = vmatpush1.bf16.msra.mxu0 %v2836_v15  ;;  %v2882_v51 = vld [vmem:[#allocation2 + $0x304] ss:$16 sps:$4 sm:$0xff]   ;;  %v2885_v53 = vld [vmem:[#allocation2 + $0x300] ss:$16 sps:$4 sm:$0xff]   ;;  %v2919_v15 = vld [vmem:[#allocation2 + $0x248] ss:$16 sps:$4 sm:$0xff]  }
 0x16c   :  { %1310 = vmatpush1.bf16.msra.mxu1 %v2837_v16  ;;  %1270 = vmatprep.subr.bf16.mxu0 %v2838_v17  ;;  %v2924_v16 = vld [vmem:[#allocation2 + $0x2c] ss:$16 sps:$4 sm:$0xff]  }
 0x16d   :  { %1311 = vmatprep.subr.bf16.mxu1 %v2840_v18  ;;  %v2927_v17 = vld [vmem:[#allocation2 + $0x22c] ss:$16 sps:$4 sm:$0xff]   ;;  %v2922_v18 = vld [vmem:[#allocation2 + $0x28] ss:$16 sps:$4 sm:$0xff]  }
 0x16f   :  { %1271 = vmatpush2.bf16.msra.mxu0 %v2842_v22  ;;  %v2925_v22 = vld [vmem:[#allocation2 + $0x228] ss:$16 sps:$4 sm:$0xff]  }
 0x170   :  { %1312 = vmatpush2.bf16.msra.mxu1 %v2843_v25  ;;  %1272 = vmatprep.subr.bf16.mxu0 %v2844_v26  ;;  %v2930_v25 = vld [vmem:[#allocation2 + $0xc] ss:$16 sps:$4 sm:$0xff]  }
 0x171   :  { %1313 = vmatprep.subr.bf16.mxu1 %v2846_v27  ;;  %v2933_v26 = vld [vmem:[#allocation2 + $0x20c] ss:$16 sps:$4 sm:$0xff]   ;;  %v2928_v27 = vld [vmem:[#allocation2 + $0x8] ss:$16 sps:$4 sm:$0xff]  }
 0x173   :  { %1273 = vmatpush2.bf16.msra.mxu0 %v2848_v28  ;;  %v2931_v28 = vld [vmem:[#allocation2 + $0x208] ss:$16 sps:$4 sm:$0xff]  }
 0x174   :  { %1314 = vmatpush2.bf16.msra.mxu1 %v2849_v29  ;;  %1274 = vmatprep.subr.bf16.mxu0 %v2850_v30  ;;  %v2936_v29 = vld [vmem:[#allocation2 + $0x1ec] ss:$16 sps:$4 sm:$0xff]  }
 0x175   :  { %1315 = vmatprep.subr.bf16.mxu1 %v2852_v31  ;;  %v2939_v30 = vld [vmem:[#allocation2 + $0x3ec] ss:$16 sps:$4 sm:$0xff]   ;;  %v2934_v31 = vld [vmem:[#allocation2 + $0x1e8] ss:$16 sps:$4 sm:$0xff]  }
 0x177   :  { %1275 = vmatpush2.bf16.msra.mxu0 %v2854_v32  ;;  %v2937_v32 = vld [vmem:[#allocation2 + $0x3e8] ss:$16 sps:$4 sm:$0xff]  }
 0x178   :  { %1316 = vmatpush2.bf16.msra.mxu1 %v2855_v33  ;;  %1276 = vmatprep.subr.bf16.mxu0 %v2856_v34  ;;  %v2942_v33 = vld [vmem:[#allocation2 + $0x1cc] ss:$16 sps:$4 sm:$0xff]  }
 0x179   :  { %1317 = vmatprep.subr.bf16.mxu1 %v2858_v3  ;;  %v2945_v34 = vld [vmem:[#allocation2 + $0x3cc] ss:$16 sps:$4 sm:$0xff]   ;;  %v2940_v3 = vld [vmem:[#allocation2 + $0x1c8] ss:$16 sps:$4 sm:$0xff]  }
 0x17b   :  { %1277 = vmatpush2.bf16.msra.mxu0 %v2860_v4  ;;  %v2943_v4 = vld [vmem:[#allocation2 + $0x3c8] ss:$16 sps:$4 sm:$0xff]  }
 0x17c   :  { %1318 = vmatpush2.bf16.msra.mxu1 %v2861_v9  ;;  %1278 = vmatprep.subr.bf16.mxu0 %v2862_v10  ;;  %v2948_v9 = vld [vmem:[#allocation2 + $0x1ac] ss:$16 sps:$4 sm:$0xff]  }
 0x17d   :  { %1319 = vmatprep.subr.bf16.mxu1 %v2864_v35  ;;  %v2951_v10 = vld [vmem:[#allocation2 + $0x3ac] ss:$16 sps:$4 sm:$0xff]   ;;  %v2946_v35 = vld [vmem:[#allocation2 + $0x1a8] ss:$16 sps:$4 sm:$0xff]  }
 0x17f   :  { %1279 = vmatpush2.bf16.msra.mxu0 %v2866_v36  ;;  %v2949_v36 = vld [vmem:[#allocation2 + $0x3a8] ss:$16 sps:$4 sm:$0xff]  }
 0x180   :  { %1320 = vmatpush2.bf16.msra.mxu1 %v2867_v37  ;;  %1280 = vmatprep.subr.bf16.mxu0 %v2868_v39  ;;  %v2954_v37 = vld [vmem:[#allocation2 + $0x18c] ss:$16 sps:$4 sm:$0xff]  }
 0x181   :  { %1321 = vmatprep.subr.bf16.mxu1 %v2870_v40  ;;  %v2957_v39 = vld [vmem:[#allocation2 + $0x38c] ss:$16 sps:$4 sm:$0xff]   ;;  %v2952_v40 = vld [vmem:[#allocation2 + $0x188] ss:$16 sps:$4 sm:$0xff]  }
 0x183   :  { %1281 = vmatpush2.bf16.msra.mxu0 %v2872_v42  ;;  %v2955_v42 = vld [vmem:[#allocation2 + $0x388] ss:$16 sps:$4 sm:$0xff]  }
 0x184   :  { %1322 = vmatpush2.bf16.msra.mxu1 %v2873_v45  ;;  %1282 = vmatprep.subr.bf16.mxu0 %v2874_v46  ;;  %v2960_v45 = vld [vmem:[#allocation2 + $0x16c] ss:$16 sps:$4 sm:$0xff]  }
 0x185   :  { %1323 = vmatprep.subr.bf16.mxu1 %v2876_v47  ;;  %v2963_v46 = vld [vmem:[#allocation2 + $0x36c] ss:$16 sps:$4 sm:$0xff]   ;;  %v2958_v47 = vld [vmem:[#allocation2 + $0x168] ss:$16 sps:$4 sm:$0xff]  }
 0x187   :  { %1283 = vmatpush2.bf16.msra.mxu0 %v2878_v48  ;;  %v2961_v48 = vld [vmem:[#allocation2 + $0x368] ss:$16 sps:$4 sm:$0xff]  }
 0x188   :  { %1324 = vmatpush2.bf16.msra.mxu1 %v2879_v49  ;;  %1284 = vmatprep.subr.bf16.mxu0 %v2880_v50  ;;  %v2966_v49 = vld [vmem:[#allocation2 + $0x14c] ss:$16 sps:$4 sm:$0xff]  }
 0x189   :  { %1325 = vmatprep.subr.bf16.mxu1 %v2882_v51  ;;  %v2969_v50 = vld [vmem:[#allocation2 + $0x34c] ss:$16 sps:$4 sm:$0xff]   ;;  %v2964_v51 = vld [vmem:[#allocation2 + $0x148] ss:$16 sps:$4 sm:$0xff]  }
 0x18b   :  { %1285 = vmatpush2.bf16.msra.mxu0 %v2884_v52  ;;  %v2967_v52 = vld [vmem:[#allocation2 + $0x348] ss:$16 sps:$4 sm:$0xff]  }
 0x18c   :  { %1326 = vmatpush2.bf16.msra.mxu1 %v2885_v53  ;;  %1336 = vmatprep.subr.bf16.mxu0 %v2888_v54  ;;  %v2972_v53 = vld [vmem:[#allocation2 + $0x12c] ss:$16 sps:$4 sm:$0xff]  }
 0x18d   :  { %1377 = vmatprep.subr.bf16.mxu1 %v2891_v56  ;;  %v2975_v54 = vld [vmem:[#allocation2 + $0x32c] ss:$16 sps:$4 sm:$0xff]   ;;  %v2970_v56 = vld [vmem:[#allocation2 + $0x128] ss:$16 sps:$4 sm:$0xff]  }
 0x18e   :  { %1287 = vmatmul.mubr.bf16.vlgmr.msra.gmra.mxu0 %v3336_v57 }
 0x18f   :  { %1328 = vmatmul.mubr.bf16.vlgmr.msra.gmra.mxu1 %v3340_v58  ;;  %1337 = vmatpush1.bf16.msra.mxu0 %v2886_v59  ;;  %v2973_v59 = vld [vmem:[#allocation2 + $0x328] ss:$16 sps:$4 sm:$0xff]  }
 0x190   :  { %1378 = vmatpush1.bf16.msra.mxu1 %v2889_v60  ;;  %1338 = vmatprep.subr.bf16.mxu0 %v2894_v61  ;;  %v2978_v60 = vld [vmem:[#allocation2 + $0x10c] ss:$16 sps:$4 sm:$0xff]  }
 0x191   :  { %1379 = vmatprep.subr.bf16.mxu1 %v2897_v62  ;;  %1368 = vmatprep.mubr.bf16.mxu0 %v3328_v43  ;;  %v2913_v43 = vld [vmem:[#allocation2 + $0x268] ss:$16 sps:$4 sm:$0xff]   ;;  %v2981_v61 = vld [vmem:[#allocation2 + $0x30c] ss:$16 sps:$4 sm:$0xff]  }
 0x192   :  { %1409 = vmatprep.mubr.bf16.mxu1 %v3330_v44  ;;  %v2918_v44 = vld [vmem:[#allocation2 + $0x4c] ss:$16 sps:$4 sm:$0xff]   ;;  %v2976_v62 = vld [vmem:[#allocation2 + $0x108] ss:$16 sps:$4 sm:$0xff]  }
 0x193   :  { %1339 = vmatpush1.bf16.msra.mxu0 %v2892_v63  ;;  %v2979_v63 = vld [vmem:[#allocation2 + $0x308] ss:$16 sps:$4 sm:$0xff]  }
 0x194   :  { %1380 = vmatpush1.bf16.msra.mxu1 %v2895_v0  ;;  %1340 = vmatprep.subr.bf16.mxu0 %v2900_v38  ;;  %v3348_v0 = vld [vmem:[#allocation7 + $0x3] ss:$8 sm:$0xf] }
 0x195   :  { %1381 = vmatprep.subr.bf16.mxu1 %v2903_v41  ;;  %v597_v38 = vrot.slane %v3348_v0, %v3275_v20  ;;  %v601_v41 = vrot.slane %v3348_v0, %v3281_v23 }
 0x197   :  { %1341 = vmatpush1.bf16.msra.mxu0 %v2898_v1 }
 0x198   :  { %1382 = vmatpush1.bf16.msra.mxu1 %v2901_v2  ;;  %1342 = vmatprep.subr.bf16.mxu0 %v2906_v5 }
 0x199   :  { %1383 = vmatprep.subr.bf16.mxu1 %v2909_v6 }
 0x19b   :  { %1343 = vmatpush1.bf16.msra.mxu0 %v2904_v19 }
 0x19c   :  { %1384 = vmatpush1.bf16.msra.mxu1 %v2907_v7  ;;  %1344 = vmatprep.subr.bf16.mxu0 %v2912_v8 }
 0x19d   :  { %1385 = vmatprep.subr.bf16.mxu1 %v2915_v11 }
 0x19f   :  { %1345 = vmatpush1.bf16.msra.mxu0 %v2910_v12 }
 0x1a0   :  { %1386 = vmatpush1.bf16.msra.mxu1 %v2913_v43  ;;  %1346 = vmatprep.subr.bf16.mxu0 %v2918_v44 }
 0x1a1   :  { %1387 = vmatprep.subr.bf16.mxu1 %v2921_v13 }
 0x1a3   :  { %1347 = vmatpush1.bf16.msra.mxu0 %v2916_v14 }
 0x1a4   :  { %1388 = vmatpush1.bf16.msra.mxu1 %v2919_v15  ;;  %1348 = vmatprep.subr.bf16.mxu0 %v2924_v16 }
 0x1a5   :  { %1389 = vmatprep.subr.bf16.mxu1 %v2927_v17 }
 0x1a7   :  { %1349 = vmatpush1.bf16.msra.mxu0 %v2922_v18 }
 0x1a8   :  { %1390 = vmatpush1.bf16.msra.mxu1 %v2925_v22  ;;  %1350 = vmatprep.subr.bf16.mxu0 %v2930_v25 }
 0x1a9   :  { %1391 = vmatprep.subr.bf16.mxu1 %v2933_v26 }
 0x1ab   :  { %1351 = vmatpush1.bf16.msra.mxu0 %v2928_v27 }
 0x1ac   :  { %1392 = vmatpush1.bf16.msra.mxu1 %v2931_v28  ;;  %1352 = vmatprep.subr.bf16.mxu0 %v2936_v29 }
 0x1ad   :  { %1393 = vmatprep.subr.bf16.mxu1 %v2939_v30 }
 0x1af   :  { %1353 = vmatpush2.bf16.msra.mxu0 %v2934_v31 }
 0x1b0   :  { %1394 = vmatpush2.bf16.msra.mxu1 %v2937_v32  ;;  %1354 = vmatprep.subr.bf16.mxu0 %v2942_v33 }
 0x1b1   :  { %1395 = vmatprep.subr.bf16.mxu1 %v2945_v34 }
 0x1b3   :  { %1355 = vmatpush2.bf16.msra.mxu0 %v2940_v3 }
 0x1b4   :  { %1396 = vmatpush2.bf16.msra.mxu1 %v2943_v4  ;;  %1356 = vmatprep.subr.bf16.mxu0 %v2948_v9 }
 0x1b5   :  { %1397 = vmatprep.subr.bf16.mxu1 %v2951_v10 }
 0x1b7   :  { %1357 = vmatpush2.bf16.msra.mxu0 %v2946_v35 }
 0x1b8   :  { %1398 = vmatpush2.bf16.msra.mxu1 %v2949_v36  ;;  %1358 = vmatprep.subr.bf16.mxu0 %v2954_v37 }
 0x1b9   :  { %1399 = vmatprep.subr.bf16.mxu1 %v2957_v39 }
 0x1bb   :  { %1359 = vmatpush2.bf16.msra.mxu0 %v2952_v40 }
 0x1bc   :  { %1400 = vmatpush2.bf16.msra.mxu1 %v2955_v42  ;;  %1360 = vmatprep.subr.bf16.mxu0 %v2960_v45 }
 0x1bd   :  { %1401 = vmatprep.subr.bf16.mxu1 %v2963_v46 }
 0x1bf   :  { %1361 = vmatpush2.bf16.msra.mxu0 %v2958_v47 }
 0x1c0   :  { %1402 = vmatpush2.bf16.msra.mxu1 %v2961_v48  ;;  %1362 = vmatprep.subr.bf16.mxu0 %v2966_v49 }
 0x1c1   :  { %1403 = vmatprep.subr.bf16.mxu1 %v2969_v50 }
 0x1c3   :  { %1363 = vmatpush2.bf16.msra.mxu0 %v2964_v51 }
 0x1c4   :  { %1404 = vmatpush2.bf16.msra.mxu1 %v2967_v52  ;;  %1364 = vmatprep.subr.bf16.mxu0 %v2972_v53 }
 0x1c5   :  { %1405 = vmatprep.subr.bf16.mxu1 %v2975_v54  ;;  %v605_v54 = vrot.slane %v3348_v0, %v3278_v21 }
 0x1c7   :  { %1365 = vmatpush2.bf16.msra.mxu0 %v2970_v56  ;;  %v609_v56 = vrot.slane %v3348_v0, %v3284_v24 }
 0x1c8   :  { %1406 = vmatpush2.bf16.msra.mxu1 %v2973_v59  ;;  %1366 = vmatprep.subr.bf16.mxu0 %v2978_v60 }
 0x1c9   :  { %1407 = vmatprep.subr.bf16.mxu1 %v2981_v61 }
 0x1cb   :  { %1367 = vmatpush2.bf16.msra.mxu0 %v2976_v62 }
 0x1cc   :  { %1408 = vmatpush2.bf16.msra.mxu1 %v2979_v63 }
 0x1ce   :  { %1369 = vmatmul.mubr.bf16.vlgmr.msra.gmra.mxu0 %v3336_v57 }
 0x1cf   :  { %1410 = vmatmul.mubr.bf16.vlgmr.msra.gmra.mxu1 %v3340_v58 }
 0x24e   :  { %v1288_v1 = vpop.f32.mrf.mxu0 }
 0x24f   :  { %v1329_v2 = vpop.f32.mrf.mxu1  ;;  %v1289_v5 = vadd.f32 %v1288_v1, %v597_v38 }
 0x250   :  { %v1290_v6 = vpop.f32.mrf.mxu0 }
 0x251   :  { %v1331_v19 = vpop.f32.mrf.mxu1  ;;  %v1330_v7 = vadd.f32 %v1329_v2, %v1289_v5  ;;  %v1291_v8 = vadd.f32 %v1290_v6, %v601_v41 }
 0x252   :  { %v1292_v11 = vpop.f32.mrf.mxu0 }
 0x253   :  { %v1333_v12 = vpop.f32.mrf.mxu1  ;;  %v1422_v57 = vrot.slane %v1330_v7, 4  ;;  %v1332_v43 = vadd.f32 %v1331_v19, %v1291_v8 }
 0x254   :  { %v1293_v58 = vpop.f32.mrf.mxu0 }
 0x255   :  { %v1334_v44 = vpop.f32.mrf.mxu1  ;;  %v1423_v13 = vadd.f32 %v1422_v57, %v1330_v7  ;;  %v1428_v14 = vrot.slane %v1332_v43, 4 }
 0x257   :  { %v1424_v15 = vrot.slane %v1423_v13, 2  ;;  %v1429_v16 = vadd.f32 %v1428_v14, %v1332_v43 }
 0x259   :  { %v1425_v17 = vadd.f32 %v1424_v15, %v1423_v13  ;;  %v1430_v18 = vrot.slane %v1429_v16, 2 }
 0x25b   :  { %v1426_v22 = vrot.slane %v1425_v17, 1  ;;  %v1431_v25 = vadd.f32 %v1430_v18, %v1429_v16 }
 0x25d   :  { %v1427_v26 = vadd.f32 %v1426_v22, %v1425_v17  ;;  %v1432_v27 = vrot.slane %v1431_v25, 1 }
 0x25f   :  { %v1446_v28 = vmul.f32 0.125, %v1427_v26  ;;  %v1433_v29 = vadd.f32 %v1432_v27, %v1431_v25 }
 0x261   :  { %v3354_v30 = vsub.f32 %v1330_v7, %v1446_v28  ;;  %v1447_v31 = vmul.f32 0.125, %v1433_v29 }
 0x263   :  { %v1454_v32 = vmul.f32 %v3354_v30, %v3354_v30  ;;  %v3358_v33 = vsub.f32 %v1332_v43, %v1447_v31 }
 0x265   :  { %v1458_v34 = vrot.slane %v1454_v32, 4  ;;  %v1455_v3 = vmul.f32 %v3358_v33, %v3358_v33 }
 0x267   :  { %v1459_v4 = vadd.f32 %v1458_v34, %v1454_v32  ;;  %v1464_v9 = vrot.slane %v1455_v3, 4 }
 0x269   :  { %v1460_v10 = vrot.slane %v1459_v4, 2  ;;  %v1465_v35 = vadd.f32 %v1464_v9, %v1455_v3 }
 0x26b   :  { %v1461_v36 = vadd.f32 %v1460_v10, %v1459_v4  ;;  %v1466_v37 = vrot.slane %v1465_v35, 2 }
 0x26d   :  { %v1462_v39 = vrot.slane %v1461_v36, 1  ;;  %v1467_v40 = vadd.f32 %v1466_v37, %v1465_v35 }
 0x26f   :  { %v1463_v42 = vadd.f32 %v1462_v39, %v1461_v36  ;;  %v1468_v45 = vrot.slane %v1467_v40, 1 }
 0x271   :  { %v1482_v46 = vmul.f32 0.125, %v1463_v42  ;;  %v1469_v47 = vadd.f32 %v1468_v45, %v1467_v40 }
 0x273   :  { %v1486_v48 = vadd.f32 1e-05, %v1482_v46  ;;  %v1483_v49 = vmul.f32 0.125, %v1469_v47 }
 0x275   :  { %v1487_v50 = vadd.f32 1e-05, %v1483_v49  ;;  %2982 = vrsqrt.f32 %v1486_v48 }
 0x277   :  { %2984 = vrsqrt.f32 %v1487_v50 }
 0x282   :  { %v2983_v51 = vpop.eup %2982 }
 0x284   :  { %v2985_v52 = vpop.eup %2984 }
 0x285   :  { %v1498_v53 = vcombine.low %v2983_v51, %v2985_v52  ;;  %v1419_v51 = vld [vmem:[#allocation7 + $0x4] ss:$8 sm:$0xf]  ;;  %v1421_v52 = vld [vmem:[#allocation7 + $0x5] ss:$8 sm:$0xf] }
 0x287   :  { %v1506_v48 = vrot.slane %v1498_v53, %v3307_v55 }
 0x28e   :  { %v1370_v59 = vpop.f32.mrf.mxu0 }
 0x28f   :  { %v1411_v60 = vpop.f32.mrf.mxu1  ;;  %v1371_v61 = vadd.f32 %v1370_v59, %v605_v54  ;;  %v1553_v59 = vrot.slane %v1421_v52, %v3275_v20 }
 0x290   :  { %v1372_v62 = vpop.f32.mrf.mxu0 }
 0x291   :  { %v1413_v63 = vpop.f32.mrf.mxu1  ;;  %v1412_v38 = vadd.f32 %v1411_v60, %v1371_v61  ;;  %v1373_v41 = vadd.f32 %v1372_v62, %v609_v56  ;;  %v1557_v60 = vrot.slane %v1421_v52, %v3281_v23  ;;  %v1561_v61 = vrot.slane %v1421_v52, %v3278_v21 }
 0x292   :  { %v1374_v1 = vpop.f32.mrf.mxu0  ;;  %v1565_v62 = vrot.slane %v1421_v52, %v3284_v24 }
 0x293   :  { %v1415_v2 = vpop.f32.mrf.mxu1  ;;  %v1434_v5 = vrot.slane %v1412_v38, 4  ;;  %v1414_v6 = vadd.f32 %v1413_v63, %v1373_v41 }
 0x294   :  { %v1375_v19 = vpop.f32.mrf.mxu0 }
 0x295   :  { %v1416_v7 = vpop.f32.mrf.mxu1  ;;  %v1435_v8 = vadd.f32 %v1434_v5, %v1412_v38  ;;  %v1440_v11 = vrot.slane %v1414_v6, 4 }
 0x297   :  { %v1436_v12 = vrot.slane %v1435_v8, 2  ;;  %v1441_v57 = vadd.f32 %v1440_v11, %v1414_v6 }
 0x299   :  { %v1437_v43 = vadd.f32 %v1436_v12, %v1435_v8  ;;  %v1442_v58 = vrot.slane %v1441_v57, 2 }
 0x29b   :  { %v1438_v0 = vrot.slane %v1437_v43, 1  ;;  %v1443_v44 = vadd.f32 %v1442_v58, %v1441_v57 }
 0x29d   :  { %v1439_v13 = vadd.f32 %v1438_v0, %v1437_v43  ;;  %v1444_v14 = vrot.slane %v1443_v44, 1 }
 0x29f   :  { %v1448_v15 = vmul.f32 0.125, %v1439_v13  ;;  %v1445_v16 = vadd.f32 %v1444_v14, %v1443_v44 }
 0x2a1   :  { %v1452_v17 = vsub.f32 %v1412_v38, %v1448_v15  ;;  %v1449_v18 = vmul.f32 0.125, %v1445_v16 }
 0x2a3   :  { %v1456_v22 = vmul.f32 %v1452_v17, %v1452_v17  ;;  %v1453_v25 = vsub.f32 %v1414_v6, %v1449_v18 }
 0x2a5   :  { %v1470_v26 = vrot.slane %v1456_v22, 4  ;;  %v1457_v27 = vmul.f32 %v1453_v25, %v1453_v25 }
 0x2a7   :  { %v1471_v28 = vadd.f32 %v1470_v26, %v1456_v22  ;;  %v1476_v29 = vrot.slane %v1457_v27, 4 }
 0x2a9   :  { %v1472_v31 = vrot.slane %v1471_v28, 2  ;;  %v1477_v32 = vadd.f32 %v1476_v29, %v1457_v27 }
 0x2ab   :  { %v1473_v34 = vadd.f32 %v1472_v31, %v1471_v28  ;;  %v1478_v3 = vrot.slane %v1477_v32, 2 }
 0x2ad   :  { %v1474_v4 = vrot.slane %v1473_v34, 1  ;;  %v1479_v9 = vadd.f32 %v1478_v3, %v1477_v32 }
 0x2af   :  { %v1475_v10 = vadd.f32 %v1474_v4, %v1473_v34  ;;  %v1480_v35 = vrot.slane %v1479_v9, 1 }
 0x2b1   :  { %v1484_v36 = vmul.f32 0.125, %v1475_v10  ;;  %v1481_v37 = vadd.f32 %v1480_v35, %v1479_v9 }
 0x2b3   :  { %v1488_v39 = vadd.f32 1e-05, %v1484_v36  ;;  %v1485_v40 = vmul.f32 0.125, %v1481_v37 }
 0x2b5   :  { %v1489_v42 = vadd.f32 1e-05, %v1485_v40  ;;  %2986 = vrsqrt.f32 %v1488_v39 }
 0x2b7   :  { %2988 = vrsqrt.f32 %v1489_v42 }
 0x2c2   :  { %v2987_v45 = vpop.eup %2986 }
 0x2c4   :  { %v2989_v46 = vpop.eup %2988 }
 0x2c5   :  { %v1499_v47 = vcombine.low %v2987_v45, %v2989_v46 }
 0x2c7   :  { %v1513_v49 = vrot.slane %v1499_v47, %v3307_v55 }
 0x2c9   :  { %v1514_v50 = vcombine.low %v1506_v48, %v1513_v49 }
 0x2cb   :  { %v1521_v54 = vrot.slane %v1514_v50, %v3307_v55 }
 0x2cd   :  { %v1523_v56 = vmul.f32 %v1521_v54, %v1419_v51 }
 0x2cf   :  { %v1528_v63 = vrot.slane %v1523_v56, %v3275_v20  ;;  %v1532_v53 = vrot.slane %v1523_v56, %v3281_v23  ;;  %v1536_v38 = vrot.slane %v1523_v56, %v3278_v21  ;;  %v1540_v41 = vrot.slane %v1523_v56, %v3284_v24 }
 0x2d1   :  { %v1545_v1 = vmul.f32 %v1528_v63, %v3354_v30  ;;  %v1546_v55 = vmul.f32 %v1532_v53, %v3358_v33  ;;  %v1547_v2 = vmul.f32 %v1536_v38, %v1452_v17  ;;  %v1548_v5 = vmul.f32 %v1540_v41, %v1453_v25 }
 0x2d3   :  { %v1570_v6 = vadd.f32 %v1553_v59, %v1545_v1  ;;  %v1571_v19 = vadd.f32 %v1557_v60, %v1546_v55  ;;  %v1572_v7 = vadd.f32 %v1561_v61, %v1547_v2  ;;  %v1573_v8 = vadd.f32 %v1565_v62, %v1548_v5 }
 0x2d5   :  { %v1578_v11 = vmin.f32 %v1570_v6, 0.0  ;;  %v1579_v12 = vmin.f32 %v1571_v19, 0.0  ;;  %v1580_v57 = vmin.f32 %v1572_v7, 0.0  ;;  %v1581_v43 = vmin.f32 %v1573_v8, 0.0 }
 0x2d6   :  { %vm1574_vm5 = vcmp.gt.f32.partialorder %v1570_v6, 0.0  ;;  %vm1575_vm6 = vcmp.gt.f32.partialorder %v1571_v19, 0.0  ;;  %vm1576_vm7 = vcmp.gt.f32.partialorder %v1572_v7, 0.0  ;;  %vm1577_vm8 = vcmp.gt.f32.partialorder %v1573_v8, 0.0 }
 0x2d7   :  { %v1582_v58 = vmul.f32 1.442695, %v1578_v11  ;;  %v1584_v0 = vmul.f32 1.442695, %v1579_v12  ;;  %v1586_v44 = vmul.f32 1.442695, %v1580_v57 }
 0x2d8   :  { %v1588_v13 = vmul.f32 1.442695, %v1581_v43 }
 0x2d9   :  { %2990 = vpow2.f32 %v1582_v58 }
 0x2da   :  { %2992 = vpow2.f32 %v1584_v0 }
 0x2db   :  { %2994 = vpow2.f32 %v1586_v44 }
 0x2dc   :  { %2996 = vpow2.f32 %v1588_v13 }
 0x2e6   :  { %v2991_v24 = vpop.eup %2990 }
 0x2e7   :  { %v2993_v30 = vpop.eup %2992  ;;  %v2596_v33 = vadd.f32 -1.0, %v2991_v24 }
 0x2e8   :  { %v2995_v14 = vpop.eup %2994  ;;  %v2597_v15 = vadd.f32 -1.0, %v2993_v30 }
 0x2e9   :  { %v2997_v16 = vpop.eup %2996  ;;  %v2598_v17 = vadd.f32 -1.0, %v2995_v14  ;;  %v3379_v18 = vsel %vm1574_vm5, %v1570_v6, %v2596_v33 }
 0x2ea   :  { %v2599_v22 = vadd.f32 -1.0, %v2997_v16  ;;  %v1595_v25 = vsel %vm1575_vm6, %v1571_v19, %v2597_v15 }
 0x2eb   :  { %v3381_v26 = vsel %vm1576_vm7, %v1572_v7, %v2598_v17 }
 0x2ec   :  { %v1597_v27 = vsel %vm1577_vm8, %v1573_v8, %v2599_v22 }
 0x2ed   :  { %3212 = dma.done.wait [#allocation4 + $0x1], 12288 }
 0x2ee   :  { %3213 = vsyncadd [#allocation4 + $0x1], 4294955008  ;;  %v3383_v28 = vpack.c.bf16 %v1595_v25, %v1595_v25  ;;  %v3385_v29 = vpack.c.bf16 %v1597_v27, %v1597_v27  ;;  %v2998_v31 = vld [vmem:[#allocation3 + $0xac] ss:$12 sps:$4 sm:$0xff]   ;;  %v3002_v34 = vld [vmem:[#allocation3 + $0xa8] ss:$12 sps:$4 sm:$0xff]  }
 0x2ef   :  { %v3000_v32 = vld [vmem:[#allocation3 + $0x22c] ss:$12 sps:$4 sm:$0xff]   ;;  %2262 = vmatprep.subr.bf16.mxu0 %v2998_v31  ;;  %v3003_v3 = vld [vmem:[#allocation3 + $0x228] ss:$12 sps:$4 sm:$0xff]   ;;  %v3008_v10 = vld [vmem:[#allocation3 + $0x90] ss:$12 sps:$4 sm:$0xff]  }
 0x2f0   :  { %2294 = vmatprep.mubr.bf16.mxu0 %v3383_v28  ;;  %2335 = vmatprep.mubr.bf16.mxu1 %v3385_v29  ;;  %v3004_v4 = vld [vmem:[#allocation3 + $0x94] ss:$12 sps:$4 sm:$0xff]   ;;  %v3009_v35 = vld [vmem:[#allocation3 + $0x210] ss:$12 sps:$4 sm:$0xff]   ;;  %v3014_v39 = vld [vmem:[#allocation3 + $0x78] ss:$12 sps:$4 sm:$0xff]  }
 0x2f1   :  { %2303 = vmatprep.subr.bf16.mxu1 %v3000_v32  ;;  %2263 = vmatpush1.bf16.msra.mxu0 %v3002_v34  ;;  %v3006_v9 = vld [vmem:[#allocation3 + $0x214] ss:$12 sps:$4 sm:$0xff]   ;;  %v3010_v36 = vld [vmem:[#allocation3 + $0x7c] ss:$12 sps:$4 sm:$0xff]   ;;  %v3015_v40 = vld [vmem:[#allocation3 + $0x1f8] ss:$12 sps:$4 sm:$0xff]  }
 0x2f2   :  { %2304 = vmatpush1.bf16.msra.mxu1 %v3003_v3  ;;  %2264 = vmatprep.subr.bf16.mxu0 %v3004_v4  ;;  %v3012_v37 = vld [vmem:[#allocation3 + $0x1fc] ss:$12 sps:$4 sm:$0xff]   ;;  %v3016_v42 = vld [vmem:[#allocation3 + $0x64] ss:$12 sps:$4 sm:$0xff]   ;;  %v3020_v46 = vld [vmem:[#allocation3 + $0x60] ss:$12 sps:$4 sm:$0xff]  }
 0x2f3   :  { %2305 = vmatprep.subr.bf16.mxu1 %v3006_v9  ;;  %v3018_v45 = vld [vmem:[#allocation3 + $0x1e4] ss:$12 sps:$4 sm:$0xff]   ;;  %v3021_v47 = vld [vmem:[#allocation3 + $0x1e0] ss:$12 sps:$4 sm:$0xff]   ;;  %v3026_v50 = vld [vmem:[#allocation3 + $0x48] ss:$12 sps:$4 sm:$0xff]  }
 0x2f4   :  { %v3022_v48 = vld [vmem:[#allocation3 + $0x4c] ss:$12 sps:$4 sm:$0xff]   ;;  %v3027_v51 = vld [vmem:[#allocation3 + $0x1c8] ss:$12 sps:$4 sm:$0xff]   ;;  %v3032_v56 = vld [vmem:[#allocation3 + $0x30] ss:$12 sps:$4 sm:$0xff]  }
 0x2f5   :  { %2265 = vmatpush1.bf16.msra.mxu0 %v3008_v10  ;;  %v3024_v49 = vld [vmem:[#allocation3 + $0x1cc] ss:$12 sps:$4 sm:$0xff]   ;;  %v3028_v52 = vld [vmem:[#allocation3 + $0x34] ss:$12 sps:$4 sm:$0xff]   ;;  %v3033_v59 = vld [vmem:[#allocation3 + $0x1b0] ss:$12 sps:$4 sm:$0xff]  }
 0x2f6   :  { %2306 = vmatpush1.bf16.msra.mxu1 %v3009_v35  ;;  %2266 = vmatprep.subr.bf16.mxu0 %v3010_v36  ;;  %v3030_v54 = vld [vmem:[#allocation3 + $0x1b4] ss:$12 sps:$4 sm:$0xff]   ;;  %v3034_v60 = vld [vmem:[#allocation3 + $0x1c] ss:$12 sps:$4 sm:$0xff]   ;;  %v3038_v62 = vld [vmem:[#allocation3 + $0x18] ss:$12 sps:$4 sm:$0xff]  }
 0x2f7   :  { %2307 = vmatprep.subr.bf16.mxu1 %v3012_v37  ;;  %v3036_v61 = vld [vmem:[#allocation3 + $0x19c] ss:$12 sps:$4 sm:$0xff]   ;;  %v3039_v63 = vld [vmem:[#allocation3 + $0x198] ss:$12 sps:$4 sm:$0xff]   ;;  %v3044_v41 = vld [vmem:[#allocation3] ss:$12 sps:$4 sm:$0xff]  }
 0x2f8   :  { %v3040_v53 = vld [vmem:[#allocation3 + $0x4] ss:$12 sps:$4 sm:$0xff]   ;;  %v3045_v1 = vld [vmem:[#allocation3 + $0x180] ss:$12 sps:$4 sm:$0xff]   ;;  %v3050_v5 = vld [vmem:[#allocation3 + $0x168] ss:$12 sps:$4 sm:$0xff]  }
 0x2f9   :  { %2267 = vmatpush1.bf16.msra.mxu0 %v3014_v39  ;;  %v3042_v38 = vld [vmem:[#allocation3 + $0x184] ss:$12 sps:$4 sm:$0xff]   ;;  %v3046_v55 = vld [vmem:[#allocation3 + $0x16c] ss:$12 sps:$4 sm:$0xff]   ;;  %v3051_v6 = vld [vmem:[#allocation3 + $0x2e8] ss:$12 sps:$4 sm:$0xff]   ;;  %v3391_v39 = vpack.c.bf16 %v3379_v18, %v3379_v18 }
 0x2fa   :  { %2308 = vmatpush1.bf16.msra.mxu1 %v3015_v40  ;;  %2268 = vmatprep.subr.bf16.mxu0 %v3016_v42  ;;  %v3048_v2 = vld [vmem:[#allocation3 + $0x2ec] ss:$12 sps:$4 sm:$0xff]   ;;  %v3052_v19 = vld [vmem:[#allocation3 + $0x154] ss:$12 sps:$4 sm:$0xff]   ;;  %v3056_v8 = vld [vmem:[#allocation3 + $0x150] ss:$12 sps:$4 sm:$0xff]   ;;  %v3395_v40 = vpack.c.bf16 %v3381_v26, %v3381_v26 }
 0x2fb   :  { %2309 = vmatprep.subr.bf16.mxu1 %v3018_v45  ;;  %v3054_v7 = vld [vmem:[#allocation3 + $0x2d4] ss:$12 sps:$4 sm:$0xff]   ;;  %v3057_v11 = vld [vmem:[#allocation3 + $0x2d0] ss:$12 sps:$4 sm:$0xff]   ;;  %v3062_v43 = vld [vmem:[#allocation3 + $0x138] ss:$12 sps:$4 sm:$0xff]  }
 0x2fc   :  { %v3058_v12 = vld [vmem:[#allocation3 + $0x13c] ss:$12 sps:$4 sm:$0xff]   ;;  %v3063_v58 = vld [vmem:[#allocation3 + $0x2b8] ss:$12 sps:$4 sm:$0xff]   ;;  %v3068_v13 = vld [vmem:[#allocation3 + $0x120] ss:$12 sps:$4 sm:$0xff]  }
 0x2fd   :  { %2269 = vmatpush1.bf16.msra.mxu0 %v3020_v46  ;;  %v3060_v57 = vld [vmem:[#allocation3 + $0x2bc] ss:$12 sps:$4 sm:$0xff]   ;;  %v3064_v0 = vld [vmem:[#allocation3 + $0x124] ss:$12 sps:$4 sm:$0xff]   ;;  %v3069_v24 = vld [vmem:[#allocation3 + $0x2a0] ss:$12 sps:$4 sm:$0xff]  }
 0x2fe   :  { %2310 = vmatpush1.bf16.msra.mxu1 %v3021_v47  ;;  %2270 = vmatprep.subr.bf16.mxu0 %v3022_v48  ;;  %v3066_v44 = vld [vmem:[#allocation3 + $0x2a4] ss:$12 sps:$4 sm:$0xff]   ;;  %v3070_v30 = vld [vmem:[#allocation3 + $0x10c] ss:$12 sps:$4 sm:$0xff]   ;;  %v3074_v14 = vld [vmem:[#allocation3 + $0x108] ss:$12 sps:$4 sm:$0xff]  }
 0x2ff   :  { %2311 = vmatprep.subr.bf16.mxu1 %v3024_v49  ;;  %v3072_v33 = vld [vmem:[#allocation3 + $0x28c] ss:$12 sps:$4 sm:$0xff]   ;;  %v3075_v15 = vld [vmem:[#allocation3 + $0x288] ss:$12 sps:$4 sm:$0xff]   ;;  %v3080_v22 = vld [vmem:[#allocation3 + $0xf0] ss:$12 sps:$4 sm:$0xff]  }
 0x300   :  { %v3076_v16 = vld [vmem:[#allocation3 + $0xf4] ss:$12 sps:$4 sm:$0xff]   ;;  %v3081_v25 = vld [vmem:[#allocation3 + $0x270] ss:$12 sps:$4 sm:$0xff]   ;;  %v3086_v32 = vld [vmem:[#allocation3 + $0xd8] ss:$12 sps:$4 sm:$0xff]  }
 0x301   :  { %2271 = vmatpush1.bf16.msra.mxu0 %v3026_v50  ;;  %v3078_v17 = vld [vmem:[#allocation3 + $0x274] ss:$12 sps:$4 sm:$0xff]   ;;  %v3082_v27 = vld [vmem:[#allocation3 + $0xdc] ss:$12 sps:$4 sm:$0xff]   ;;  %v3087_v34 = vld [vmem:[#allocation3 + $0x258] ss:$12 sps:$4 sm:$0xff]  }
 0x302   :  { %2312 = vmatpush1.bf16.msra.mxu1 %v3027_v51  ;;  %2272 = vmatprep.subr.bf16.mxu0 %v3028_v52  ;;  %v3084_v31 = vld [vmem:[#allocation3 + $0x25c] ss:$12 sps:$4 sm:$0xff]   ;;  %v3088_v3 = vld [vmem:[#allocation3 + $0xc4] ss:$12 sps:$4 sm:$0xff]   ;;  %v3092_v9 = vld [vmem:[#allocation3 + $0xc0] ss:$12 sps:$4 sm:$0xff]  }
 0x303   :  { %2313 = vmatprep.subr.bf16.mxu1 %v3030_v54  ;;  %v3090_v4 = vld [vmem:[#allocation3 + $0x244] ss:$12 sps:$4 sm:$0xff]   ;;  %v3093_v10 = vld [vmem:[#allocation3 + $0x240] ss:$12 sps:$4 sm:$0xff]   ;;  %v3106_v51 = vld [vmem:[#allocation3 + $0x128] ss:$12 sps:$4 sm:$0xff]  }
 0x304   :  { %v3094_v35 = vld [vmem:[#allocation3 + $0x170] ss:$12 sps:$4 sm:$0xff]   ;;  %v3098_v45 = vld [vmem:[#allocation3 + $0x158] ss:$12 sps:$4 sm:$0xff]   ;;  %v3102_v18 = vld [vmem:[#allocation3 + $0x140] ss:$12 sps:$4 sm:$0xff]  }
 0x305   :  { %2273 = vmatpush1.bf16.msra.mxu0 %v3032_v56  ;;  %v3095_v36 = vld [vmem:[#allocation3 + $0x2f0] ss:$12 sps:$4 sm:$0xff]   ;;  %v3099_v46 = vld [vmem:[#allocation3 + $0x2d8] ss:$12 sps:$4 sm:$0xff]   ;;  %v3103_v26 = vld [vmem:[#allocation3 + $0x2c0] ss:$12 sps:$4 sm:$0xff]  }
 0x306   :  { %2314 = vmatpush1.bf16.msra.mxu1 %v3033_v59  ;;  %2274 = vmatprep.subr.bf16.mxu0 %v3034_v60  ;;  %v3096_v37 = vld [vmem:[#allocation3 + $0xb0] ss:$12 sps:$4 sm:$0xff]   ;;  %v3100_v47 = vld [vmem:[#allocation3 + $0x98] ss:$12 sps:$4 sm:$0xff]   ;;  %v3104_v49 = vld [vmem:[#allocation3 + $0x80] ss:$12 sps:$4 sm:$0xff]  }
 0x307   :  { %2315 = vmatprep.subr.bf16.mxu1 %v3036_v61  ;;  %v3097_v42 = vld [vmem:[#allocation3 + $0x230] ss:$12 sps:$4 sm:$0xff]   ;;  %v3101_v48 = vld [vmem:[#allocation3 + $0x218] ss:$12 sps:$4 sm:$0xff]   ;;  %v3105_v50 = vld [vmem:[#allocation3 + $0x200] ss:$12 sps:$4 sm:$0xff]  }
 0x308   :  { %v3107_v52 = vld [vmem:[#allocation3 + $0x2a8] ss:$12 sps:$4 sm:$0xff]   ;;  %v3110_v59 = vld [vmem:[#allocation3 + $0x110] ss:$12 sps:$4 sm:$0xff]  }
 0x309   :  { %2275 = vmatpush1.bf16.msra.mxu0 %v3038_v62  ;;  %v3108_v54 = vld [vmem:[#allocation3 + $0x68] ss:$12 sps:$4 sm:$0xff]   ;;  %v3111_v60 = vld [vmem:[#allocation3 + $0x290] ss:$12 sps:$4 sm:$0xff]   ;;  %v3115_v62 = vld [vmem:[#allocation3 + $0x278] ss:$12 sps:$4 sm:$0xff]  }
 0x30a   :  { %2316 = vmatpush1.bf16.msra.mxu1 %v3039_v63  ;;  %2276 = vmatprep.subr.bf16.mxu0 %v3040_v53  ;;  %v3109_v56 = vld [vmem:[#allocation3 + $0x1e8] ss:$12 sps:$4 sm:$0xff]   ;;  %v3113_v61 = vld [vmem:[#allocation3 + $0x1d0] ss:$12 sps:$4 sm:$0xff]   ;;  %v3116_v63 = vld [vmem:[#allocation3 + $0x38] ss:$12 sps:$4 sm:$0xff]  }
 0x30b   :  { %2317 = vmatprep.subr.bf16.mxu1 %v3042_v38  ;;  %v3117_v53 = vld [vmem:[#allocation3 + $0x1b8] ss:$12 sps:$4 sm:$0xff]   ;;  %v3118_v38 = vld [vmem:[#allocation3 + $0xe0] ss:$12 sps:$4 sm:$0xff]  }
 0x30d   :  { %2277 = vmatpush1.bf16.msra.mxu0 %v3044_v41  ;;  %v3119_v41 = vld [vmem:[#allocation3 + $0x260] ss:$12 sps:$4 sm:$0xff]  }
 0x30e   :  { %2318 = vmatpush1.bf16.msra.mxu1 %v3045_v1  ;;  %2278 = vmatprep.subr.bf16.mxu0 %v3046_v55  ;;  %v3120_v1 = vld [vmem:[#allocation3 + $0x20] ss:$12 sps:$4 sm:$0xff]  }
 0x30f   :  { %2319 = vmatprep.subr.bf16.mxu1 %v3048_v2  ;;  %v3121_v55 = vld [vmem:[#allocation3 + $0x1a0] ss:$12 sps:$4 sm:$0xff]   ;;  %v3122_v2 = vld [vmem:[#allocation3 + $0xc8] ss:$12 sps:$4 sm:$0xff]  }
 0x311   :  { %2279 = vmatpush2.bf16.msra.mxu0 %v3050_v5  ;;  %v3123_v5 = vld [vmem:[#allocation3 + $0x248] ss:$12 sps:$4 sm:$0xff]  }
 0x312   :  { %2320 = vmatpush2.bf16.msra.mxu1 %v3051_v6  ;;  %2280 = vmatprep.subr.bf16.mxu0 %v3052_v19  ;;  %v3124_v6 = vld [vmem:[#allocation3 + $0x8] ss:$12 sps:$4 sm:$0xff]  }
 0x313   :  { %2321 = vmatprep.subr.bf16.mxu1 %v3054_v7  ;;  %v3125_v19 = vld [vmem:[#allocation3 + $0x188] ss:$12 sps:$4 sm:$0xff]   ;;  %v1733_v7 = vld [vmem:[%s3421_s3] sm:$0x7] }
 0x315   :  { %2281 = vmatpush2.bf16.msra.mxu0 %v3056_v8  ;;  %v1738_v8 = vrot.slane %v1733_v7, %v3275_v20 }
 0x316   :  { %2322 = vmatpush2.bf16.msra.mxu1 %v3057_v11  ;;  %2282 = vmatprep.subr.bf16.mxu0 %v3058_v12  ;;  %v1742_v11 = vrot.slane %v1733_v7, %v3281_v23 }
 0x317   :  { %2323 = vmatprep.subr.bf16.mxu1 %v3060_v57 }
 0x319   :  { %2283 = vmatpush2.bf16.msra.mxu0 %v3062_v43 }
 0x31a   :  { %2324 = vmatpush2.bf16.msra.mxu1 %v3063_v58  ;;  %2284 = vmatprep.subr.bf16.mxu0 %v3064_v0 }
 0x31b   :  { %2325 = vmatprep.subr.bf16.mxu1 %v3066_v44 }
 0x31d   :  { %2285 = vmatpush2.bf16.msra.mxu0 %v3068_v13 }
 0x31e   :  { %2326 = vmatpush2.bf16.msra.mxu1 %v3069_v24  ;;  %2286 = vmatprep.subr.bf16.mxu0 %v3070_v30 }
 0x31f   :  { %2327 = vmatprep.subr.bf16.mxu1 %v3072_v33 }
 0x321   :  { %2287 = vmatpush2.bf16.msra.mxu0 %v3074_v14 }
 0x322   :  { %2328 = vmatpush2.bf16.msra.mxu1 %v3075_v15  ;;  %2288 = vmatprep.subr.bf16.mxu0 %v3076_v16  ;;  %v1746_v16 = vrot.slane %v1733_v7, %v3278_v21 }
 0x323   :  { %2329 = vmatprep.subr.bf16.mxu1 %v3078_v17 }
 0x325   :  { %2289 = vmatpush2.bf16.msra.mxu0 %v3080_v22 }
 0x326   :  { %2330 = vmatpush2.bf16.msra.mxu1 %v3081_v25  ;;  %2290 = vmatprep.subr.bf16.mxu0 %v3082_v27 }
 0x327   :  { %2331 = vmatprep.subr.bf16.mxu1 %v3084_v31 }
 0x329   :  { %2291 = vmatpush2.bf16.msra.mxu0 %v3086_v32 }
 0x32a   :  { %2332 = vmatpush2.bf16.msra.mxu1 %v3087_v34  ;;  %2292 = vmatprep.subr.bf16.mxu0 %v3088_v3 }
 0x32b   :  { %2333 = vmatprep.subr.bf16.mxu1 %v3090_v4 }
 0x32d   :  { %2293 = vmatpush2.bf16.msra.mxu0 %v3092_v9 }
 0x32e   :  { %2334 = vmatpush2.bf16.msra.mxu1 %v3093_v10  ;;  %2698 = vmatprep.subr.bf16.mxu0 %v3094_v35 }
 0x32f   :  { %2720 = vmatprep.subr.bf16.mxu1 %v3095_v36 }
 0x330   :  { %2295 = vmatmul.mubr.bf16.vlgmr.msra.gmra.mxu0 %v3391_v39 }
 0x331   :  { %2336 = vmatmul.mubr.bf16.vlgmr.msra.gmra.mxu1 %v3395_v40  ;;  %2699 = vmatpush3.bf16.msra.mxu0 %v3096_v37 }
 0x332   :  { %2721 = vmatpush3.bf16.msra.mxu1 %v3097_v42  ;;  %2700 = vmatprep.subr.bf16.mxu0 %v3098_v45 }
 0x333   :  { %2722 = vmatprep.subr.bf16.mxu1 %v3099_v46  ;;  %2376 = vmatprep.mubr.bf16.mxu0 %v3383_v28  ;;  %v3112_v28 = vld [vmem:[#allocation3 + $0x50] ss:$12 sps:$4 sm:$0xff]  }
 0x334   :  { %2416 = vmatprep.mubr.bf16.mxu1 %v3385_v29  ;;  %v3114_v29 = vld [vmem:[#allocation3 + $0xf8] ss:$12 sps:$4 sm:$0xff]  }
 0x335   :  { %2701 = vmatpush3.bf16.msra.mxu0 %v3100_v47 }
 0x336   :  { %2723 = vmatpush3.bf16.msra.mxu1 %v3101_v48  ;;  %2702 = vmatprep.subr.bf16.mxu0 %v3102_v18 }
 0x337   :  { %2724 = vmatprep.subr.bf16.mxu1 %v3103_v26 }
 0x339   :  { %2703 = vmatpush3.bf16.msra.mxu0 %v3104_v49 }
 0x33a   :  { %2725 = vmatpush3.bf16.msra.mxu1 %v3105_v50  ;;  %2704 = vmatprep.subr.bf16.mxu0 %v3106_v51 }
 0x33b   :  { %2726 = vmatprep.subr.bf16.mxu1 %v3107_v52 }
 0x33d   :  { %2705 = vmatpush3.bf16.msra.mxu0 %v3108_v54 }
 0x33e   :  { %2727 = vmatpush3.bf16.msra.mxu1 %v3109_v56  ;;  %2706 = vmatprep.subr.bf16.mxu0 %v3110_v59 }
 0x33f   :  { %2728 = vmatprep.subr.bf16.mxu1 %v3111_v60 }
 0x341   :  { %2707 = vmatpush3.bf16.msra.mxu0 %v3112_v28 }
 0x342   :  { %2729 = vmatpush3.bf16.msra.mxu1 %v3113_v61  ;;  %2708 = vmatprep.subr.bf16.mxu0 %v3114_v29 }
 0x343   :  { %2730 = vmatprep.subr.bf16.mxu1 %v3115_v62 }
 0x345   :  { %2709 = vmatpush3.bf16.msra.mxu0 %v3116_v63 }
 0x346   :  { %2731 = vmatpush3.bf16.msra.mxu1 %v3117_v53  ;;  %2710 = vmatprep.subr.bf16.mxu0 %v3118_v38 }
 0x347   :  { %2732 = vmatprep.subr.bf16.mxu1 %v3119_v41 }
 0x349   :  { %2711 = vmatpush3.bf16.msra.mxu0 %v3120_v1 }
 0x34a   :  { %2733 = vmatpush3.bf16.msra.mxu1 %v3121_v55  ;;  %2712 = vmatprep.subr.bf16.mxu0 %v3122_v2 }
 0x34b   :  { %2734 = vmatprep.subr.bf16.mxu1 %v3123_v5 }
 0x34d   :  { %2713 = vmatpush3.bf16.msra.mxu0 %v3124_v6 }
 0x34e   :  { %2735 = vmatpush3.bf16.msra.mxu1 %v3125_v19 }
 0x350   :  { %2377 = vmatmul.mubr.bf16.vlgmr.msra.gmra.mxu0 %v3391_v39 }
 0x351   :  { %2417 = vmatmul.mubr.bf16.vlgmr.msra.gmra.mxu1 %v3395_v40 }
 0x3f0   :  { %v2296_v12 = vpop.f32.mrf.mxu0 }
 0x3f1   :  { %v2337_v57 = vpop.f32.mrf.mxu1  ;;  %v2297_v43 = vadd.f32 %v2296_v12, %v1738_v8 }
 0x3f2   :  { %v2298_v58 = vpop.f32.mrf.mxu0 }
 0x3f3   :  { %v2339_v0 = vpop.f32.mrf.mxu1  ;;  %v2338_v44 = vadd.f32 %v2337_v57, %v2297_v43  ;;  %v2299_v13 = vadd.f32 %v2298_v58, %v1742_v11 }
 0x3f4   :  { %v2300_v24 = vpop.f32.mrf.mxu0 }
 0x3f5   :  { %v2341_v30 = vpop.f32.mrf.mxu1  ;;  %2424 = vst [vmem:[%s3424_s6] sm:$0xff] %v2338_v44  ;;  %v2340_v33 = vadd.f32 %v2339_v0, %v2299_v13 }
 0x3f6   :  { %v2301_v14 = vpop.f32.mrf.mxu0 }
 0x3f7   :  { %v2342_v15 = vpop.f32.mrf.mxu1  ;;  %2425 = vst [vmem:[%s3424_s6 + $0x8] sm:$0xff] %v2340_v33 }
 0x410   :  { %v2714_v20 = vpop.f32.mrf.mxu0 }
 0x411   :  { %v2736_v23 = vpop.f32.mrf.mxu1 }
 0x412   :  { %v2715_v17 = vpop.f32.mrf.mxu0 }
 0x413   :  { %v2737_v22 = vpop.f32.mrf.mxu1  ;;  %v2716_v25 = vadd.f32 %v2715_v17, %v2714_v20 }
 0x414   :  { %v2717_v27 = vpop.f32.mrf.mxu0  ;;  %v2738_v34 = vadd.f32 %v2737_v22, %v2736_v23 }
 0x415   :  { %v2739_v31 = vpop.f32.mrf.mxu1  ;;  %v2379_v32 = vadd.f32 %v2716_v25, %v1746_v16 }
 0x416   :  { %v2718_v3 = vpop.f32.mrf.mxu0 }
 0x417   :  { %v2740_v4 = vpop.f32.mrf.mxu1  ;;  %v2419_v9 = vadd.f32 %v2738_v34, %v2379_v32 }
 0x419   :  { %2426 = vst [vmem:[%s3424_s6 + $0x10] sm:$0xff] %v2419_v9 }
 0x41a   :  { %2431 = vsyncpa [#allocation6], 1 }
 0x41b   :  { %2432 = vsyncpa [#allocation8], 1 }
 0x41c   :  { %2433 = vsyncmov [#allocation4] }
 0x41f   :  { %s2434_s23 = vpop.sfrf %2433 }
 0x420   :  { %p2696_p6 = scmp.ne.s32.totalorder %s2434_s23, 0 }
 0x422   :  { %2438 = shalt.err (%p2696_p6)  }
 0x423   :  { %2440 = vsyncmov [#allocation4 + $0x1] }
 0x426   :  { %s2441_s24 = vpop.sfrf %2440 }
 0x427   :  { %p2697_p7 = scmp.ne.s32.totalorder %s2441_s24, 0 }
 0x429   :  { %2445 = shalt.err (%p2697_p7)  }

</bundles_post_ra>
